<compile_context>
chip_gen: v7x
topology: tpu7x:2x2x1
jax: 0.10.0
libtpu: 0.0.40
codegen_flags: <defaults>
</compile_context>

<pallas_src>
import jax
import jax.numpy as jnp
import numpy as np
from jax.experimental import pallas as pl
from jax.experimental.pallas import tpu as pltpu


def _make_lstm_kernel(seq_len, input_dim, hidden_dim, output_dim, layers):
    H = hidden_dim

    def cell(z, c_prev):
        # z: (1, 4H) pre-activation in PyTorch gate order [i, f, g, o].
        # Two full-width EUP pushes (sigmoid + tanh) instead of four per-gate ones.
        sg = jax.nn.sigmoid(z)
        th = jnp.tanh(z)
        i_g = sg[:, 0 * H:1 * H]
        f_g = sg[:, 1 * H:2 * H]
        g_g = th[:, 2 * H:3 * H]
        o_g = sg[:, 3 * H:4 * H]
        c_new = f_g * c_prev + i_g * g_g
        h_new = o_g * jnp.tanh(c_new)
        return h_new, c_new

    def kernel(x_ref, wih0_ref, wihr_ref, whh_ref, b_ref, fcw_ref, fcb_ref,
               out_ref):
        # Hoisted layer-0 input projection over the whole sequence:
        # one (seq_len, input_dim) @ (input_dim, 4H) matmul + bias, done once,
        # off the serial recurrent dependency chain.
        xproj = (jnp.dot(x_ref[...], wih0_ref[...],
                         preferred_element_type=jnp.float32)
                 + b_ref[0])                                   # (seq_len, 4H)

        # h/c carried as vreg values across fully unrolled static loops.
        h = [jnp.zeros((1, H), jnp.float32) for _ in range(layers)]
        c = [jnp.zeros((1, H), jnp.float32) for _ in range(layers)]

        for t in range(seq_len):                               # static unroll
            # layer 0: only the recurrent dot remains on the critical path
            z0 = xproj[t:t + 1, :] + jnp.dot(
                h[0], whh_ref[0], preferred_element_type=jnp.float32)
            h[0], c[0] = cell(z0, c[0])
            for l in range(1, layers):                         # static unroll
                z = (jnp.dot(h[l - 1], wihr_ref[l - 1],
                             preferred_element_type=jnp.float32)
                     + jnp.dot(h[l], whh_ref[l],
                               preferred_element_type=jnp.float32)
                     + b_ref[l])
                h[l], c[l] = cell(z, c[l])

        h_top = h[layers - 1]                                  # (1, H)
        if output_dim == 1:
            # FC as VPU multiply + XLU lane-reduce; avoids a tail MXU push/pop.
            pred = (jnp.sum(h_top * fcw_ref[...], axis=-1, keepdims=True)
                    + fcb_ref[...])                            # (1, 1)
        else:
            pred = (jnp.dot(h_top, fcw_ref[...],
                            preferred_element_type=jnp.float32)
                    + fcb_ref[...])                            # (1, output_dim)
        out_ref[...] = pred

    return kernel


def init_lstm_params(key, input_dim, hidden_dim, output_dim, layers):
    """PyTorch-style init: U(-1/sqrt(H), 1/sqrt(H)) for every tensor."""
    H = hidden_dim
    bound = 1.0 / np.sqrt(H)
    params = {"layers": []}
    for l in range(layers):
        in_l = input_dim if l == 0 else H
        key, k1, k2, k3, k4 = jax.random.split(key, 5)
        w_ih = jax.random.uniform(k1, (4 * H, in_l), jnp.float32, -bound, bound)
        w_hh = jax.random.uniform(k2, (4 * H, H), jnp.float32, -bound, bound)
        b_ih = jax.random.uniform(k3, (4 * H,), jnp.float32, -bound, bound)
        b_hh = jax.random.uniform(k4, (4 * H,), jnp.float32, -bound, bound)
        params["layers"].append((w_ih, w_hh, b_ih, b_hh))
    key, k1, k2 = jax.random.split(key, 3)
    fc_w = jax.random.uniform(k1, (output_dim, H), jnp.float32, -bound, bound)
    fc_b = jax.random.uniform(k2, (output_dim,), jnp.float32, -bound, bound)
    params["fc"] = (fc_w, fc_b)
    return params


def net_forward_pallas(x, params, hidden_dim, output_dim, layers):
    seq_len, input_dim = x.shape
    H = hidden_dim
    G = 4 * H

    # Plain-JAX glue: fuse gates by simple transpose (PyTorch rows are already
    # stacked [i;f;g;o]), fold the two biases, and pack layers into slabs.
    wih_list, whh_list, b_list = [], [], []
    for (w_ih, w_hh, b_ih, b_hh) in params["layers"]:
        wih_list.append(jnp.asarray(w_ih.T, jnp.float32))        # (in_l, 4H)
        whh_list.append(jnp.asarray(w_hh.T, jnp.float32))        # (H, 4H)
        b_list.append((b_ih + b_hh).astype(jnp.float32).reshape(1, G))

    wih0 = wih_list[0]                                           # (input_dim, 4H)
    if layers > 1:
        wih_rest = jnp.stack(wih_list[1:], axis=0)               # (L-1, H, 4H)
    else:
        wih_rest = jnp.zeros((1, H, G), jnp.float32)             # dummy, unused
    whh_all = jnp.stack(whh_list, axis=0)                        # (L, H, 4H)
    b_all = jnp.stack(b_list, axis=0)                            # (L, 1, 4H)

    fc_w, fc_b = params["fc"]
    if output_dim == 1:
        fcw = jnp.asarray(fc_w, jnp.float32).reshape(1, H)       # row vector
    else:
        fcw = jnp.asarray(fc_w.T, jnp.float32)                   # (H, out)
    fcb = jnp.asarray(fc_b, jnp.float32).reshape(1, output_dim)

    kernel = _make_lstm_kernel(seq_len, input_dim, H, output_dim, layers)
    out = pl.pallas_call(
        kernel,
        out_shape=jax.ShapeDtypeStruct((1, output_dim), jnp.float32),
        in_specs=[pl.BlockSpec(memory_space=pltpu.MemorySpace.VMEM)] * 7,
        out_specs=pl.BlockSpec(memory_space=pltpu.MemorySpace.VMEM),
    )(x.astype(jnp.float32), wih0, wih_rest, whh_all, b_all, fcw, fcb)
    return out[0]   # == predictions[-1], shape (output_dim,)


def net_forward_reference(x, params, hidden_dim, layers):
    """Pure-JAX reference mirroring torch.nn.LSTM semantics."""
    H = hidden_dim
    h = [jnp.zeros((H,), jnp.float32) for _ in range(layers)]
    c = [jnp.zeros((H,), jnp.float32) for _ in range(layers)]
    last = None
    for t in range(x.shape[0]):
        inp = x[t]
        for l in range(layers):
            w_ih, w_hh, b_ih, b_hh = params["layers"][l]
            gates = w_ih @ inp + b_ih + w_hh @ h[l] + b_hh
            i = jax.nn.sigmoid(gates[0 * H:1 * H])
            f = jax.nn.sigmoid(gates[1 * H:2 * H])
            g = jnp.tanh(gates[2 * H:3 * H])
            o = jax.nn.sigmoid(gates[3 * H:4 * H])
            c[l] = f * c[l] + i * g
            h[l] = o * jnp.tanh(c[l])
            inp = h[l]
        last = h[layers - 1]
    fc_w, fc_b = params["fc"]
    return fc_w @ last + fc_b


if __name__ == "__main__":
    seq_len, input_dim, hidden_dim, output_dim, layers = 8, 4, 32, 1, 2

    key = jax.random.PRNGKey(0)
    kx, kp = jax.random.split(key)
    x = jax.random.normal(kx, (seq_len, input_dim), jnp.float32)
    params = init_lstm_params(kp, input_dim, hidden_dim, output_dim, layers)

    out = net_forward_pallas(x, params, hidden_dim, output_dim, layers)
    out = jax.block_until_ready(out)

    ref = net_forward_reference(x, params, hidden_dim, layers)
    assert out.shape == (output_dim,)
    np.testing.assert_allclose(np.asarray(out), np.asarray(ref), rtol=1e-4, atol=1e-5)

    print("KERNEL_OK")
</pallas_src>

<mosaic_0001>
module attributes {stable_mosaic.version = 11 : i64} {
  func.func @kernel(%arg0: memref<8x4xf32, #tpu.memory_space<vmem>>, %arg1: memref<4x128xf32, #tpu.memory_space<vmem>>, %arg2: memref<1x32x128xf32, #tpu.memory_space<vmem>>, %arg3: memref<2x32x128xf32, #tpu.memory_space<vmem>>, %arg4: memref<2x1x128xf32, #tpu.memory_space<vmem>>, %arg5: memref<1x32xf32, #tpu.memory_space<vmem>>, %arg6: memref<1x1xf32, #tpu.memory_space<vmem>>, %arg7: memref<1x1xf32, #tpu.memory_space<vmem>>) attributes {dimension_semantics = [], scalar_prefetch = 0 : i64, scratch_operands = 0 : i64, tpu.core_type = #tpu.core_type<tc>} {
    %c0 = arith.constant 0 : index
    %c0_0 = arith.constant 0 : index
    %0 = vector.load %arg0[%c0, %c0_0] : memref<8x4xf32, #tpu.memory_space<vmem>>, vector<8x4xf32>
    %c0_1 = arith.constant 0 : index
    %c0_2 = arith.constant 0 : index
    %1 = vector.load %arg1[%c0_1, %c0_2] : memref<4x128xf32, #tpu.memory_space<vmem>>, vector<4x128xf32>
    %cst = arith.constant dense<0.000000e+00> : vector<8x128xf32>
    %2 = tpu.matmul %0, %1, %cst {dimension_numbers = #tpu.dot_dimension_numbers<[1], [0], [0], [1], [0, 0, 1, 1], [], []>} : vector<8x4xf32>, vector<4x128xf32>, vector<8x128xf32> -> vector<8x128xf32>
    %c0_3 = arith.constant 0 : index
    %c0_4 = arith.constant 0 : index
    %c0_5 = arith.constant 0 : index
    %3 = vector.load %arg4[%c0_3, %c0_4, %c0_5] : memref<2x1x128xf32, #tpu.memory_space<vmem>>, vector<1x1x128xf32>
    %4 = vector.shape_cast %3 : vector<1x1x128xf32> to vector<1x128xf32>
    %5 = vector.broadcast %4 : vector<1x128xf32> to vector<8x128xf32>
    %6 = arith.addf %2, %5 : vector<8x128xf32>
    %cst_6 = arith.constant 0.000000e+00 : f32
    %7 = vector.broadcast %cst_6 : f32 to vector<1x32xf32>
    %cst_7 = arith.constant 0.000000e+00 : f32
    %8 = vector.broadcast %cst_7 : f32 to vector<1x32xf32>
    %cst_8 = arith.constant 0.000000e+00 : f32
    %9 = vector.broadcast %cst_8 : f32 to vector<1x32xf32>
    %cst_9 = arith.constant 0.000000e+00 : f32
    %10 = vector.broadcast %cst_9 : f32 to vector<1x32xf32>
    %11 = vector.extract_strided_slice %6 {offsets = [0, 0], sizes = [1, 128], strides = [1, 1]} : vector<8x128xf32> to vector<1x128xf32>
    %c0_10 = arith.constant 0 : index
    %c0_11 = arith.constant 0 : index
    %c0_12 = arith.constant 0 : index
    %12 = vector.load %arg3[%c0_10, %c0_11, %c0_12] : memref<2x32x128xf32, #tpu.memory_space<vmem>>, vector<1x32x128xf32>
    %13 = vector.shape_cast %12 : vector<1x32x128xf32> to vector<32x128xf32>
    %cst_13 = arith.constant dense<0.000000e+00> : vector<1x128xf32>
    %14 = tpu.matmul %7, %13, %cst_13 {dimension_numbers = #tpu.dot_dimension_numbers<[1], [0], [0], [1], [0, 0, 1, 1], [], []>} : vector<1x32xf32>, vector<32x128xf32>, vector<1x128xf32> -> vector<1x128xf32>
    %15 = arith.addf %11, %14 : vector<1x128xf32>
    %16 = arith.negf %15 : vector<1x128xf32>
    %17 = math.exp %16 : vector<1x128xf32>
    %cst_14 = arith.constant 1.000000e+00 : f32
    %18 = vector.broadcast %cst_14 : f32 to vector<1x128xf32>
    %19 = arith.addf %18, %17 : vector<1x128xf32>
    %20 = arith.divf %18, %19 : vector<1x128xf32>
    %21 = math.tanh %15 : vector<1x128xf32>
    %22 = vector.extract_strided_slice %20 {offsets = [0, 0], sizes = [1, 32], strides = [1, 1]} : vector<1x128xf32> to vector<1x32xf32>
    %23 = vector.extract_strided_slice %20 {offsets = [0, 32], sizes = [1, 32], strides = [1, 1]} : vector<1x128xf32> to vector<1x32xf32>
    %24 = vector.extract_strided_slice %21 {offsets = [0, 64], sizes = [1, 32], strides = [1, 1]} : vector<1x128xf32> to vector<1x32xf32>
    %25 = vector.extract_strided_slice %20 {offsets = [0, 96], sizes = [1, 32], strides = [1, 1]} : vector<1x128xf32> to vector<1x32xf32>
    %26 = arith.mulf %23, %9 : vector<1x32xf32>
    %27 = arith.mulf %22, %24 : vector<1x32xf32>
    %28 = arith.addf %26, %27 : vector<1x32xf32>
    %29 = math.tanh %28 : vector<1x32xf32>
    %30 = arith.mulf %25, %29 : vector<1x32xf32>
    %c0_15 = arith.constant 0 : index
    %c0_16 = arith.constant 0 : index
    %c0_17 = arith.constant 0 : index
    %31 = vector.load %arg2[%c0_15, %c0_16, %c0_17] : memref<1x32x128xf32, #tpu.memory_space<vmem>>, vector<1x32x128xf32>
    %32 = vector.shape_cast %31 : vector<1x32x128xf32> to vector<32x128xf32>
    %cst_18 = arith.constant dense<0.000000e+00> : vector<1x128xf32>
    %33 = tpu.matmul %30, %32, %cst_18 {dimension_numbers = #tpu.dot_dimension_numbers<[1], [0], [0], [1], [0, 0, 1, 1], [], []>} : vector<1x32xf32>, vector<32x128xf32>, vector<1x128xf32> -> vector<1x128xf32>
    %c1 = arith.constant 1 : index
    %c0_19 = arith.constant 0 : index
    %c0_20 = arith.constant 0 : index
    %34 = vector.load %arg3[%c1, %c0_19, %c0_20] : memref<2x32x128xf32, #tpu.memory_space<vmem>>, vector<1x32x128xf32>
    %35 = vector.shape_cast %34 : vector<1x32x128xf32> to vector<32x128xf32>
    %cst_21 = arith.constant dense<0.000000e+00> : vector<1x128xf32>
    %36 = tpu.matmul %8, %35, %cst_21 {dimension_numbers = #tpu.dot_dimension_numbers<[1], [0], [0], [1], [0, 0, 1, 1], [], []>} : vector<1x32xf32>, vector<32x128xf32>, vector<1x128xf32> -> vector<1x128xf32>
    %37 = arith.addf %33, %36 : vector<1x128xf32>
    %c1_22 = arith.constant 1 : index
    %c0_23 = arith.constant 0 : index
    %c0_24 = arith.constant 0 : index
    %38 = vector.load %arg4[%c1_22, %c0_23, %c0_24] : memref<2x1x128xf32, #tpu.memory_space<vmem>>, vector<1x1x128xf32>
    %39 = vector.shape_cast %38 : vector<1x1x128xf32> to vector<1x128xf32>
    %40 = arith.addf %37, %39 : vector<1x128xf32>
    %41 = arith.negf %40 : vector<1x128xf32>
    %42 = math.exp %41 : vector<1x128xf32>
    %cst_25 = arith.constant 1.000000e+00 : f32
    %43 = vector.broadcast %cst_25 : f32 to vector<1x128xf32>
    %44 = arith.addf %43, %42 : vector<1x128xf32>
    %45 = arith.divf %43, %44 : vector<1x128xf32>
    %46 = math.tanh %40 : vector<1x128xf32>
    %47 = vector.extract_strided_slice %45 {offsets = [0, 0], sizes = [1, 32], strides = [1, 1]} : vector<1x128xf32> to vector<1x32xf32>
    %48 = vector.extract_strided_slice %45 {offsets = [0, 32], sizes = [1, 32], strides = [1, 1]} : vector<1x128xf32> to vector<1x32xf32>
    %49 = vector.extract_strided_slice %46 {offsets = [0, 64], sizes = [1, 32], strides = [1, 1]} : vector<1x128xf32> to vector<1x32xf32>
    %50 = vector.extract_strided_slice %45 {offsets = [0, 96], sizes = [1, 32], strides = [1, 1]} : vector<1x128xf32> to vector<1x32xf32>
    %51 = arith.mulf %48, %10 : vector<1x32xf32>
    %52 = arith.mulf %47, %49 : vector<1x32xf32>
    %53 = arith.addf %51, %52 : vector<1x32xf32>
    %54 = math.tanh %53 : vector<1x32xf32>
    %55 = arith.mulf %50, %54 : vector<1x32xf32>
    %56 = vector.extract_strided_slice %6 {offsets = [1, 0], sizes = [1, 128], strides = [1, 1]} : vector<8x128xf32> to vector<1x128xf32>
    %c0_26 = arith.constant 0 : index
    %c0_27 = arith.constant 0 : index
    %c0_28 = arith.constant 0 : index
    %57 = vector.load %arg3[%c0_26, %c0_27, %c0_28] : memref<2x32x128xf32, #tpu.memory_space<vmem>>, vector<1x32x128xf32>
    %58 = vector.shape_cast %57 : vector<1x32x128xf32> to vector<32x128xf32>
    %cst_29 = arith.constant dense<0.000000e+00> : vector<1x128xf32>
    %59 = tpu.matmul %30, %58, %cst_29 {dimension_numbers = #tpu.dot_dimension_numbers<[1], [0], [0], [1], [0, 0, 1, 1], [], []>} : vector<1x32xf32>, vector<32x128xf32>, vector<1x128xf32> -> vector<1x128xf32>
    %60 = arith.addf %56, %59 : vector<1x128xf32>
    %61 = arith.negf %60 : vector<1x128xf32>
    %62 = math.exp %61 : vector<1x128xf32>
    %cst_30 = arith.constant 1.000000e+00 : f32
    %63 = vector.broadcast %cst_30 : f32 to vector<1x128xf32>
    %64 = arith.addf %63, %62 : vector<1x128xf32>
    %65 = arith.divf %63, %64 : vector<1x128xf32>
    %66 = math.tanh %60 : vector<1x128xf32>
    %67 = vector.extract_strided_slice %65 {offsets = [0, 0], sizes = [1, 32], strides = [1, 1]} : vector<1x128xf32> to vector<1x32xf32>
    %68 = vector.extract_strided_slice %65 {offsets = [0, 32], sizes = [1, 32], strides = [1, 1]} : vector<1x128xf32> to vector<1x32xf32>
    %69 = vector.extract_strided_slice %66 {offsets = [0, 64], sizes = [1, 32], strides = [1, 1]} : vector<1x128xf32> to vector<1x32xf32>
    %70 = vector.extract_strided_slice %65 {offsets = [0, 96], sizes = [1, 32], strides = [1, 1]} : vector<1x128xf32> to vector<1x32xf32>
    %71 = arith.mulf %68, %28 : vector<1x32xf32>
    %72 = arith.mulf %67, %69 : vector<1x32xf32>
    %73 = arith.addf %71, %72 : vector<1x32xf32>
    %74 = math.tanh %73 : vector<1x32xf32>
    %75 = arith.mulf %70, %74 : vector<1x32xf32>
    %c0_31 = arith.constant 0 : index
    %c0_32 = arith.constant 0 : index
    %c0_33 = arith.constant 0 : index
    %76 = vector.load %arg2[%c0_31, %c0_32, %c0_33] : memref<1x32x128xf32, #tpu.memory_space<vmem>>, vector<1x32x128xf32>
    %77 = vector.shape_cast %76 : vector<1x32x128xf32> to vector<32x128xf32>
    %cst_34 = arith.constant dense<0.000000e+00> : vector<1x128xf32>
    %78 = tpu.matmul %75, %77, %cst_34 {dimension_numbers = #tpu.dot_dimension_numbers<[1], [0], [0], [1], [0, 0, 1, 1], [], []>} : vector<1x32xf32>, vector<32x128xf32>, vector<1x128xf32> -> vector<1x128xf32>
    %c1_35 = arith.constant 1 : index
    %c0_36 = arith.constant 0 : index
    %c0_37 = arith.constant 0 : index
    %79 = vector.load %arg3[%c1_35, %c0_36, %c0_37] : memref<2x32x128xf32, #tpu.memory_space<vmem>>, vector<1x32x128xf32>
    %80 = vector.shape_cast %79 : vector<1x32x128xf32> to vector<32x128xf32>
    %cst_38 = arith.constant dense<0.000000e+00> : vector<1x128xf32>
    %81 = tpu.matmul %55, %80, %cst_38 {dimension_numbers = #tpu.dot_dimension_numbers<[1], [0], [0], [1], [0, 0, 1, 1], [], []>} : vector<1x32xf32>, vector<32x128xf32>, vector<1x128xf32> -> vector<1x128xf32>
    %82 = arith.addf %78, %81 : vector<1x128xf32>
    %c1_39 = arith.constant 1 : index
    %c0_40 = arith.constant 0 : index
    %c0_41 = arith.constant 0 : index
    %83 = vector.load %arg4[%c1_39, %c0_40, %c0_41] : memref<2x1x128xf32, #tpu.memory_space<vmem>>, vector<1x1x128xf32>
    %84 = vector.shape_cast %83 : vector<1x1x128xf32> to vector<1x128xf32>
    %85 = arith.addf %82, %84 : vector<1x128xf32>
    %86 = arith.negf %85 : vector<1x128xf32>
    %87 = math.exp %86 : vector<1x128xf32>
    %cst_42 = arith.constant 1.000000e+00 : f32
    %88 = vector.broadcast %cst_42 : f32 to vector<1x128xf32>
    %89 = arith.addf %88, %87 : vector<1x128xf32>
    %90 = arith.divf %88, %89 : vector<1x128xf32>
    %91 = math.tanh %85 : vector<1x128xf32>
    %92 = vector.extract_strided_slice %90 {offsets = [0, 0], sizes = [1, 32], strides = [1, 1]} : vector<1x128xf32> to vector<1x32xf32>
    %93 = vector.extract_strided_slice %90 {offsets = [0, 32], sizes = [1, 32], strides = [1, 1]} : vector<1x128xf32> to vector<1x32xf32>
    %94 = vector.extract_strided_slice %91 {offsets = [0, 64], sizes = [1, 32], strides = [1, 1]} : vector<1x128xf32> to vector<1x32xf32>
    %95 = vector.extract_strided_slice %90 {offsets = [0, 96], sizes = [1, 32], strides = [1, 1]} : vector<1x128xf32> to vector<1x32xf32>
    %96 = arith.mulf %93, %53 : vector<1x32xf32>
    %97 = arith.mulf %92, %94 : vector<1x32xf32>
    %98 = arith.addf %96, %97 : vector<1x32xf32>
    %99 = math.tanh %98 : vector<1x32xf32>
    %100 = arith.mulf %95, %99 : vector<1x32xf32>
    %101 = vector.extract_strided_slice %6 {offsets = [2, 0], sizes = [1, 128], strides = [1, 1]} : vector<8x128xf32> to vector<1x128xf32>
    %c0_43 = arith.constant 0 : index
    %c0_44 = arith.constant 0 : index
    %c0_45 = arith.constant 0 : index
    %102 = vector.load %arg3[%c0_43, %c0_44, %c0_45] : memref<2x32x128xf32, #tpu.memory_space<vmem>>, vector<1x32x128xf32>
    %103 = vector.shape_cast %102 : vector<1x32x128xf32> to vector<32x128xf32>
    %cst_46 = arith.constant dense<0.000000e+00> : vector<1x128xf32>
    %104 = tpu.matmul %75, %103, %cst_46 {dimension_numbers = #tpu.dot_dimension_numbers<[1], [0], [0], [1], [0, 0, 1, 1], [], []>} : vector<1x32xf32>, vector<32x128xf32>, vector<1x128xf32> -> vector<1x128xf32>
    %105 = arith.addf %101, %104 : vector<1x128xf32>
    %106 = arith.negf %105 : vector<1x128xf32>
    %107 = math.exp %106 : vector<1x128xf32>
    %cst_47 = arith.constant 1.000000e+00 : f32
    %108 = vector.broadcast %cst_47 : f32 to vector<1x128xf32>
    %109 = arith.addf %108, %107 : vector<1x128xf32>
    %110 = arith.divf %108, %109 : vector<1x128xf32>
    %111 = math.tanh %105 : vector<1x128xf32>
    %112 = vector.extract_strided_slice %110 {offsets = [0, 0], sizes = [1, 32], strides = [1, 1]} : vector<1x128xf32> to vector<1x32xf32>
    %113 = vector.extract_strided_slice %110 {offsets = [0, 32], sizes = [1, 32], strides = [1, 1]} : vector<1x128xf32> to vector<1x32xf32>
    %114 = vector.extract_strided_slice %111 {offsets = [0, 64], sizes = [1, 32], strides = [1, 1]} : vector<1x128xf32> to vector<1x32xf32>
    %115 = vector.extract_strided_slice %110 {offsets = [0, 96], sizes = [1, 32], strides = [1, 1]} : vector<1x128xf32> to vector<1x32xf32>
    %116 = arith.mulf %113, %73 : vector<1x32xf32>
    %117 = arith.mulf %112, %114 : vector<1x32xf32>
    %118 = arith.addf %116, %117 : vector<1x32xf32>
    %119 = math.tanh %118 : vector<1x32xf32>
    %120 = arith.mulf %115, %119 : vector<1x32xf32>
    %c0_48 = arith.constant 0 : index
    %c0_49 = arith.constant 0 : index
    %c0_50 = arith.constant 0 : index
    %121 = vector.load %arg2[%c0_48, %c0_49, %c0_50] : memref<1x32x128xf32, #tpu.memory_space<vmem>>, vector<1x32x128xf32>
    %122 = vector.shape_cast %121 : vector<1x32x128xf32> to vector<32x128xf32>
    %cst_51 = arith.constant dense<0.000000e+00> : vector<1x128xf32>
    %123 = tpu.matmul %120, %122, %cst_51 {dimension_numbers = #tpu.dot_dimension_numbers<[1], [0], [0], [1], [0, 0, 1, 1], [], []>} : vector<1x32xf32>, vector<32x128xf32>, vector<1x128xf32> -> vector<1x128xf32>
    %c1_52 = arith.constant 1 : index
    %c0_53 = arith.constant 0 : index
    %c0_54 = arith.constant 0 : index
    %124 = vector.load %arg3[%c1_52, %c0_53, %c0_54] : memref<2x32x128xf32, #tpu.memory_space<vmem>>, vector<1x32x128xf32>
    %125 = vector.shape_cast %124 : vector<1x32x128xf32> to vector<32x128xf32>
    %cst_55 = arith.constant dense<0.000000e+00> : vector<1x128xf32>
    %126 = tpu.matmul %100, %125, %cst_55 {dimension_numbers = #tpu.dot_dimension_numbers<[1], [0], [0], [1], [0, 0, 1, 1], [], []>} : vector<1x32xf32>, vector<32x128xf32>, vector<1x128xf32> -> vector<1x128xf32>
    %127 = arith.addf %123, %126 : vector<1x128xf32>
    %c1_56 = arith.constant 1 : index
    %c0_57 = arith.constant 0 : index
    %c0_58 = arith.constant 0 : index
    %128 = vector.load %arg4[%c1_56, %c0_57, %c0_58] : memref<2x1x128xf32, #tpu.memory_space<vmem>>, vector<1x1x128xf32>
    %129 = vector.shape_cast %128 : vector<1x1x128xf32> to vector<1x128xf32>
    %130 = arith.addf %127, %129 : vector<1x128xf32>
    %131 = arith.negf %130 : vector<1x128xf32>
    %132 = math.exp %131 : vector<1x128xf32>
    %cst_59 = arith.constant 1.000000e+00 : f32
    %133 = vector.broadcast %cst_59 : f32 to vector<1x128xf32>
    %134 = arith.addf %133, %132 : vector<1x128xf32>
    %135 = arith.divf %133, %134 : vector<1x128xf32>
    %136 = math.tanh %130 : vector<1x128xf32>
    %137 = vector.extract_strided_slice %135 {offsets = [0, 0], sizes = [1, 32], strides = [1, 1]} : vector<1x128xf32> to vector<1x32xf32>
    %138 = vector.extract_strided_slice %135 {offsets = [0, 32], sizes = [1, 32], strides = [1, 1]} : vector<1x128xf32> to vector<1x32xf32>
    %139 = vector.extract_strided_slice %136 {offsets = [0, 64], sizes = [1, 32], strides = [1, 1]} : vector<1x128xf32> to vector<1x32xf32>
    %140 = vector.extract_strided_slice %135 {offsets = [0, 96], sizes = [1, 32], strides = [1, 1]} : vector<1x128xf32> to vector<1x32xf32>
    %141 = arith.mulf %138, %98 : vector<1x32xf32>
    %142 = arith.mulf %137, %139 : vector<1x32xf32>
    %143 = arith.addf %141, %142 : vector<1x32xf32>
    %144 = math.tanh %143 : vector<1x32xf32>
    %145 = arith.mulf %140, %144 : vector<1x32xf32>
    %146 = vector.extract_strided_slice %6 {offsets = [3, 0], sizes = [1, 128], strides = [1, 1]} : vector<8x128xf32> to vector<1x128xf32>
    %c0_60 = arith.constant 0 : index
    %c0_61 = arith.constant 0 : index
    %c0_62 = arith.constant 0 : index
    %147 = vector.load %arg3[%c0_60, %c0_61, %c0_62] : memref<2x32x128xf32, #tpu.memory_space<vmem>>, vector<1x32x128xf32>
    %148 = vector.shape_cast %147 : vector<1x32x128xf32> to vector<32x128xf32>
    %cst_63 = arith.constant dense<0.000000e+00> : vector<1x128xf32>
    %149 = tpu.matmul %120, %148, %cst_63 {dimension_numbers = #tpu.dot_dimension_numbers<[1], [0], [0], [1], [0, 0, 1, 1], [], []>} : vector<1x32xf32>, vector<32x128xf32>, vector<1x128xf32> -> vector<1x128xf32>
    %150 = arith.addf %146, %149 : vector<1x128xf32>
    %151 = arith.negf %150 : vector<1x128xf32>
    %152 = math.exp %151 : vector<1x128xf32>
    %cst_64 = arith.constant 1.000000e+00 : f32
    %153 = vector.broadcast %cst_64 : f32 to vector<1x128xf32>
    %154 = arith.addf %153, %152 : vector<1x128xf32>
    %155 = arith.divf %153, %154 : vector<1x128xf32>
    %156 = math.tanh %150 : vector<1x128xf32>
    %157 = vector.extract_strided_slice %155 {offsets = [0, 0], sizes = [1, 32], strides = [1, 1]} : vector<1x128xf32> to vector<1x32xf32>
    %158 = vector.extract_strided_slice %155 {offsets = [0, 32], sizes = [1, 32], strides = [1, 1]} : vector<1x128xf32> to vector<1x32xf32>
    %159 = vector.extract_strided_slice %156 {offsets = [0, 64], sizes = [1, 32], strides = [1, 1]} : vector<1x128xf32> to vector<1x32xf32>
    %160 = vector.extract_strided_slice %155 {offsets = [0, 96], sizes = [1, 32], strides = [1, 1]} : vector<1x128xf32> to vector<1x32xf32>
    %161 = arith.mulf %158, %118 : vector<1x32xf32>
    %162 = arith.mulf %157, %159 : vector<1x32xf32>
    %163 = arith.addf %161, %162 : vector<1x32xf32>
    %164 = math.tanh %163 : vector<1x32xf32>
    %165 = arith.mulf %160, %164 : vector<1x32xf32>
    %c0_65 = arith.constant 0 : index
    %c0_66 = arith.constant 0 : index
    %c0_67 = arith.constant 0 : index
    %166 = vector.load %arg2[%c0_65, %c0_66, %c0_67] : memref<1x32x128xf32, #tpu.memory_space<vmem>>, vector<1x32x128xf32>
    %167 = vector.shape_cast %166 : vector<1x32x128xf32> to vector<32x128xf32>
    %cst_68 = arith.constant dense<0.000000e+00> : vector<1x128xf32>
    %168 = tpu.matmul %165, %167, %cst_68 {dimension_numbers = #tpu.dot_dimension_numbers<[1], [0], [0], [1], [0, 0, 1, 1], [], []>} : vector<1x32xf32>, vector<32x128xf32>, vector<1x128xf32> -> vector<1x128xf32>
    %c1_69 = arith.constant 1 : index
    %c0_70 = arith.constant 0 : index
    %c0_71 = arith.constant 0 : index
    %169 = vector.load %arg3[%c1_69, %c0_70, %c0_71] : memref<2x32x128xf32, #tpu.memory_space<vmem>>, vector<1x32x128xf32>
    %170 = vector.shape_cast %169 : vector<1x32x128xf32> to vector<32x128xf32>
    %cst_72 = arith.constant dense<0.000000e+00> : vector<1x128xf32>
    %171 = tpu.matmul %145, %170, %cst_72 {dimension_numbers = #tpu.dot_dimension_numbers<[1], [0], [0], [1], [0, 0, 1, 1], [], []>} : vector<1x32xf32>, vector<32x128xf32>, vector<1x128xf32> -> vector<1x128xf32>
    %172 = arith.addf %168, %171 : vector<1x128xf32>
    %c1_73 = arith.constant 1 : index
    %c0_74 = arith.constant 0 : index
    %c0_75 = arith.constant 0 : index
    %173 = vector.load %arg4[%c1_73, %c0_74, %c0_75] : memref<2x1x128xf32, #tpu.memory_space<vmem>>, vector<1x1x128xf32>
    %174 = vector.shape_cast %173 : vector<1x1x128xf32> to vector<1x128xf32>
    %175 = arith.addf %172, %174 : vector<1x128xf32>
    %176 = arith.negf %175 : vector<1x128xf32>
    %177 = math.exp %176 : vector<1x128xf32>
    %cst_76 = arith.constant 1.000000e+00 : f32
    %178 = vector.broadcast %cst_76 : f32 to vector<1x128xf32>
    %179 = arith.addf %178, %177 : vector<1x128xf32>
    %180 = arith.divf %178, %179 : vector<1x128xf32>
    %181 = math.tanh %175 : vector<1x128xf32>
    %182 = vector.extract_strided_slice %180 {offsets = [0, 0], sizes = [1, 32], strides = [1, 1]} : vector<1x128xf32> to vector<1x32xf32>
    %183 = vector.extract_strided_slice %180 {offsets = [0, 32], sizes = [1, 32], strides = [1, 1]} : vector<1x128xf32> to vector<1x32xf32>
    %184 = vector.extract_strided_slice %181 {offsets = [0, 64], sizes = [1, 32], strides = [1, 1]} : vector<1x128xf32> to vector<1x32xf32>
    %185 = vector.extract_strided_slice %180 {offsets = [0, 96], sizes = [1, 32], strides = [1, 1]} : vector<1x128xf32> to vector<1x32xf32>
    %186 = arith.mulf %183, %143 : vector<1x32xf32>
    %187 = arith.mulf %182, %184 : vector<1x32xf32>
    %188 = arith.addf %186, %187 : vector<1x32xf32>
    %189 = math.tanh %188 : vector<1x32xf32>
    %190 = arith.mulf %185, %189 : vector<1x32xf32>
    %191 = vector.extract_strided_slice %6 {offsets = [4, 0], sizes = [1, 128], strides = [1, 1]} : vector<8x128xf32> to vector<1x128xf32>
    %c0_77 = arith.constant 0 : index
    %c0_78 = arith.constant 0 : index
    %c0_79 = arith.constant 0 : index
    %192 = vector.load %arg3[%c0_77, %c0_78, %c0_79] : memref<2x32x128xf32, #tpu.memory_space<vmem>>, vector<1x32x128xf32>
    %193 = vector.shape_cast %192 : vector<1x32x128xf32> to vector<32x128xf32>
    %cst_80 = arith.constant dense<0.000000e+00> : vector<1x128xf32>
    %194 = tpu.matmul %165, %193, %cst_80 {dimension_numbers = #tpu.dot_dimension_numbers<[1], [0], [0], [1], [0, 0, 1, 1], [], []>} : vector<1x32xf32>, vector<32x128xf32>, vector<1x128xf32> -> vector<1x128xf32>
    %195 = arith.addf %191, %194 : vector<1x128xf32>
    %196 = arith.negf %195 : vector<1x128xf32>
    %197 = math.exp %196 : vector<1x128xf32>
    %cst_81 = arith.constant 1.000000e+00 : f32
    %198 = vector.broadcast %cst_81 : f32 to vector<1x128xf32>
    %199 = arith.addf %198, %197 : vector<1x128xf32>
    %200 = arith.divf %198, %199 : vector<1x128xf32>
    %201 = math.tanh %195 : vector<1x128xf32>
    %202 = vector.extract_strided_slice %200 {offsets = [0, 0], sizes = [1, 32], strides = [1, 1]} : vector<1x128xf32> to vector<1x32xf32>
    %203 = vector.extract_strided_slice %200 {offsets = [0, 32], sizes = [1, 32], strides = [1, 1]} : vector<1x128xf32> to vector<1x32xf32>
    %204 = vector.extract_strided_slice %201 {offsets = [0, 64], sizes = [1, 32], strides = [1, 1]} : vector<1x128xf32> to vector<1x32xf32>
    %205 = vector.extract_strided_slice %200 {offsets = [0, 96], sizes = [1, 32], strides = [1, 1]} : vector<1x128xf32> to vector<1x32xf32>
    %206 = arith.mulf %203, %163 : vector<1x32xf32>
    %207 = arith.mulf %202, %204 : vector<1x32xf32>
    %208 = arith.addf %206, %207 : vector<1x32xf32>
    %209 = math.tanh %208 : vector<1x32xf32>
    %210 = arith.mulf %205, %209 : vector<1x32xf32>
    %c0_82 = arith.constant 0 : index
    %c0_83 = arith.constant 0 : index
    %c0_84 = arith.constant 0 : index
    %211 = vector.load %arg2[%c0_82, %c0_83, %c0_84] : memref<1x32x128xf32, #tpu.memory_space<vmem>>, vector<1x32x128xf32>
    %212 = vector.shape_cast %211 : vector<1x32x128xf32> to vector<32x128xf32>
    %cst_85 = arith.constant dense<0.000000e+00> : vector<1x128xf32>
    %213 = tpu.matmul %210, %212, %cst_85 {dimension_numbers = #tpu.dot_dimension_numbers<[1], [0], [0], [1], [0, 0, 1, 1], [], []>} : vector<1x32xf32>, vector<32x128xf32>, vector<1x128xf32> -> vector<1x128xf32>
    %c1_86 = arith.constant 1 : index
    %c0_87 = arith.constant 0 : index
    %c0_88 = arith.constant 0 : index
    %214 = vector.load %arg3[%c1_86, %c0_87, %c0_88] : memref<2x32x128xf32, #tpu.memory_space<vmem>>, vector<1x32x128xf32>
    %215 = vector.shape_cast %214 : vector<1x32x128xf32> to vector<32x128xf32>
    %cst_89 = arith.constant dense<0.000000e+00> : vector<1x128xf32>
    %216 = tpu.matmul %190, %215, %cst_89 {dimension_numbers = #tpu.dot_dimension_numbers<[1], [0], [0], [1], [0, 0, 1, 1], [], []>} : vector<1x32xf32>, vector<32x128xf32>, vector<1x128xf32> -> vector<1x128xf32>
    %217 = arith.addf %213, %216 : vector<1x128xf32>
    %c1_90 = arith.constant 1 : index
    %c0_91 = arith.constant 0 : index
    %c0_92 = arith.constant 0 : index
    %218 = vector.load %arg4[%c1_90, %c0_91, %c0_92] : memref<2x1x128xf32, #tpu.memory_space<vmem>>, vector<1x1x128xf32>
    %219 = vector.shape_cast %218 : vector<1x1x128xf32> to vector<1x128xf32>
    %220 = arith.addf %217, %219 : vector<1x128xf32>
    %221 = arith.negf %220 : vector<1x128xf32>
    %222 = math.exp %221 : vector<1x128xf32>
    %cst_93 = arith.constant 1.000000e+00 : f32
    %223 = vector.broadcast %cst_93 : f32 to vector<1x128xf32>
    %224 = arith.addf %223, %222 : vector<1x128xf32>
    %225 = arith.divf %223, %224 : vector<1x128xf32>
    %226 = math.tanh %220 : vector<1x128xf32>
    %227 = vector.extract_strided_slice %225 {offsets = [0, 0], sizes = [1, 32], strides = [1, 1]} : vector<1x128xf32> to vector<1x32xf32>
    %228 = vector.extract_strided_slice %225 {offsets = [0, 32], sizes = [1, 32], strides = [1, 1]} : vector<1x128xf32> to vector<1x32xf32>
    %229 = vector.extract_strided_slice %226 {offsets = [0, 64], sizes = [1, 32], strides = [1, 1]} : vector<1x128xf32> to vector<1x32xf32>
    %230 = vector.extract_strided_slice %225 {offsets = [0, 96], sizes = [1, 32], strides = [1, 1]} : vector<1x128xf32> to vector<1x32xf32>
    %231 = arith.mulf %228, %188 : vector<1x32xf32>
    %232 = arith.mulf %227, %229 : vector<1x32xf32>
    %233 = arith.addf %231, %232 : vector<1x32xf32>
    %234 = math.tanh %233 : vector<1x32xf32>
    %235 = arith.mulf %230, %234 : vector<1x32xf32>
    %236 = vector.extract_strided_slice %6 {offsets = [5, 0], sizes = [1, 128], strides = [1, 1]} : vector<8x128xf32> to vector<1x128xf32>
    %c0_94 = arith.constant 0 : index
    %c0_95 = arith.constant 0 : index
    %c0_96 = arith.constant 0 : index
    %237 = vector.load %arg3[%c0_94, %c0_95, %c0_96] : memref<2x32x128xf32, #tpu.memory_space<vmem>>, vector<1x32x128xf32>
    %238 = vector.shape_cast %237 : vector<1x32x128xf32> to vector<32x128xf32>
    %cst_97 = arith.constant dense<0.000000e+00> : vector<1x128xf32>
    %239 = tpu.matmul %210, %238, %cst_97 {dimension_numbers = #tpu.dot_dimension_numbers<[1], [0], [0], [1], [0, 0, 1, 1], [], []>} : vector<1x32xf32>, vector<32x128xf32>, vector<1x128xf32> -> vector<1x128xf32>
    %240 = arith.addf %236, %239 : vector<1x128xf32>
    %241 = arith.negf %240 : vector<1x128xf32>
    %242 = math.exp %241 : vector<1x128xf32>
    %cst_98 = arith.constant 1.000000e+00 : f32
    %243 = vector.broadcast %cst_98 : f32 to vector<1x128xf32>
    %244 = arith.addf %243, %242 : vector<1x128xf32>
    %245 = arith.divf %243, %244 : vector<1x128xf32>
    %246 = math.tanh %240 : vector<1x128xf32>
    %247 = vector.extract_strided_slice %245 {offsets = [0, 0], sizes = [1, 32], strides = [1, 1]} : vector<1x128xf32> to vector<1x32xf32>
    %248 = vector.extract_strided_slice %245 {offsets = [0, 32], sizes = [1, 32], strides = [1, 1]} : vector<1x128xf32> to vector<1x32xf32>
    %249 = vector.extract_strided_slice %246 {offsets = [0, 64], sizes = [1, 32], strides = [1, 1]} : vector<1x128xf32> to vector<1x32xf32>
    %250 = vector.extract_strided_slice %245 {offsets = [0, 96], sizes = [1, 32], strides = [1, 1]} : vector<1x128xf32> to vector<1x32xf32>
    %251 = arith.mulf %248, %208 : vector<1x32xf32>
    %252 = arith.mulf %247, %249 : vector<1x32xf32>
    %253 = arith.addf %251, %252 : vector<1x32xf32>
    %254 = math.tanh %253 : vector<1x32xf32>
    %255 = arith.mulf %250, %254 : vector<1x32xf32>
    %c0_99 = arith.constant 0 : index
    %c0_100 = arith.constant 0 : index
    %c0_101 = arith.constant 0 : index
    %256 = vector.load %arg2[%c0_99, %c0_100, %c0_101] : memref<1x32x128xf32, #tpu.memory_space<vmem>>, vector<1x32x128xf32>
    %257 = vector.shape_cast %256 : vector<1x32x128xf32> to vector<32x128xf32>
    %cst_102 = arith.constant dense<0.000000e+00> : vector<1x128xf32>
    %258 = tpu.matmul %255, %257, %cst_102 {dimension_numbers = #tpu.dot_dimension_numbers<[1], [0], [0], [1], [0, 0, 1, 1], [], []>} : vector<1x32xf32>, vector<32x128xf32>, vector<1x128xf32> -> vector<1x128xf32>
    %c1_103 = arith.constant 1 : index
    %c0_104 = arith.constant 0 : index
    %c0_105 = arith.constant 0 : index
    %259 = vector.load %arg3[%c1_103, %c0_104, %c0_105] : memref<2x32x128xf32, #tpu.memory_space<vmem>>, vector<1x32x128xf32>
    %260 = vector.shape_cast %259 : vector<1x32x128xf32> to vector<32x128xf32>
    %cst_106 = arith.constant dense<0.000000e+00> : vector<1x128xf32>
    %261 = tpu.matmul %235, %260, %cst_106 {dimension_numbers = #tpu.dot_dimension_numbers<[1], [0], [0], [1], [0, 0, 1, 1], [], []>} : vector<1x32xf32>, vector<32x128xf32>, vector<1x128xf32> -> vector<1x128xf32>
    %262 = arith.addf %258, %261 : vector<1x128xf32>
    %c1_107 = arith.constant 1 : index
    %c0_108 = arith.constant 0 : index
    %c0_109 = arith.constant 0 : index
    %263 = vector.load %arg4[%c1_107, %c0_108, %c0_109] : memref<2x1x128xf32, #tpu.memory_space<vmem>>, vector<1x1x128xf32>
    %264 = vector.shape_cast %263 : vector<1x1x128xf32> to vector<1x128xf32>
    %265 = arith.addf %262, %264 : vector<1x128xf32>
    %266 = arith.negf %265 : vector<1x128xf32>
    %267 = math.exp %266 : vector<1x128xf32>
    %cst_110 = arith.constant 1.000000e+00 : f32
    %268 = vector.broadcast %cst_110 : f32 to vector<1x128xf32>
    %269 = arith.addf %268, %267 : vector<1x128xf32>
    %270 = arith.divf %268, %269 : vector<1x128xf32>
    %271 = math.tanh %265 : vector<1x128xf32>
    %272 = vector.extract_strided_slice %270 {offsets = [0, 0], sizes = [1, 32], strides = [1, 1]} : vector<1x128xf32> to vector<1x32xf32>
    %273 = vector.extract_strided_slice %270 {offsets = [0, 32], sizes = [1, 32], strides = [1, 1]} : vector<1x128xf32> to vector<1x32xf32>
    %274 = vector.extract_strided_slice %271 {offsets = [0, 64], sizes = [1, 32], strides = [1, 1]} : vector<1x128xf32> to vector<1x32xf32>
    %275 = vector.extract_strided_slice %270 {offsets = [0, 96], sizes = [1, 32], strides = [1, 1]} : vector<1x128xf32> to vector<1x32xf32>
    %276 = arith.mulf %273, %233 : vector<1x32xf32>
    %277 = arith.mulf %272, %274 : vector<1x32xf32>
    %278 = arith.addf %276, %277 : vector<1x32xf32>
    %279 = math.tanh %278 : vector<1x32xf32>
    %280 = arith.mulf %275, %279 : vector<1x32xf32>
    %281 = vector.extract_strided_slice %6 {offsets = [6, 0], sizes = [1, 128], strides = [1, 1]} : vector<8x128xf32> to vector<1x128xf32>
    %c0_111 = arith.constant 0 : index
    %c0_112 = arith.constant 0 : index
    %c0_113 = arith.constant 0 : index
    %282 = vector.load %arg3[%c0_111, %c0_112, %c0_113] : memref<2x32x128xf32, #tpu.memory_space<vmem>>, vector<1x32x128xf32>
    %283 = vector.shape_cast %282 : vector<1x32x128xf32> to vector<32x128xf32>
    %cst_114 = arith.constant dense<0.000000e+00> : vector<1x128xf32>
    %284 = tpu.matmul %255, %283, %cst_114 {dimension_numbers = #tpu.dot_dimension_numbers<[1], [0], [0], [1], [0, 0, 1, 1], [], []>} : vector<1x32xf32>, vector<32x128xf32>, vector<1x128xf32> -> vector<1x128xf32>
    %285 = arith.addf %281, %284 : vector<1x128xf32>
    %286 = arith.negf %285 : vector<1x128xf32>
    %287 = math.exp %286 : vector<1x128xf32>
    %cst_115 = arith.constant 1.000000e+00 : f32
    %288 = vector.broadcast %cst_115 : f32 to vector<1x128xf32>
    %289 = arith.addf %288, %287 : vector<1x128xf32>
    %290 = arith.divf %288, %289 : vector<1x128xf32>
    %291 = math.tanh %285 : vector<1x128xf32>
    %292 = vector.extract_strided_slice %290 {offsets = [0, 0], sizes = [1, 32], strides = [1, 1]} : vector<1x128xf32> to vector<1x32xf32>
    %293 = vector.extract_strided_slice %290 {offsets = [0, 32], sizes = [1, 32], strides = [1, 1]} : vector<1x128xf32> to vector<1x32xf32>
    %294 = vector.extract_strided_slice %291 {offsets = [0, 64], sizes = [1, 32], strides = [1, 1]} : vector<1x128xf32> to vector<1x32xf32>
    %295 = vector.extract_strided_slice %290 {offsets = [0, 96], sizes = [1, 32], strides = [1, 1]} : vector<1x128xf32> to vector<1x32xf32>
    %296 = arith.mulf %293, %253 : vector<1x32xf32>
    %297 = arith.mulf %292, %294 : vector<1x32xf32>
    %298 = arith.addf %296, %297 : vector<1x32xf32>
    %299 = math.tanh %298 : vector<1x32xf32>
    %300 = arith.mulf %295, %299 : vector<1x32xf32>
    %c0_116 = arith.constant 0 : index
    %c0_117 = arith.constant 0 : index
    %c0_118 = arith.constant 0 : index
    %301 = vector.load %arg2[%c0_116, %c0_117, %c0_118] : memref<1x32x128xf32, #tpu.memory_space<vmem>>, vector<1x32x128xf32>
    %302 = vector.shape_cast %301 : vector<1x32x128xf32> to vector<32x128xf32>
    %cst_119 = arith.constant dense<0.000000e+00> : vector<1x128xf32>
    %303 = tpu.matmul %300, %302, %cst_119 {dimension_numbers = #tpu.dot_dimension_numbers<[1], [0], [0], [1], [0, 0, 1, 1], [], []>} : vector<1x32xf32>, vector<32x128xf32>, vector<1x128xf32> -> vector<1x128xf32>
    %c1_120 = arith.constant 1 : index
    %c0_121 = arith.constant 0 : index
    %c0_122 = arith.constant 0 : index
    %304 = vector.load %arg3[%c1_120, %c0_121, %c0_122] : memref<2x32x128xf32, #tpu.memory_space<vmem>>, vector<1x32x128xf32>
    %305 = vector.shape_cast %304 : vector<1x32x128xf32> to vector<32x128xf32>
    %cst_123 = arith.constant dense<0.000000e+00> : vector<1x128xf32>
    %306 = tpu.matmul %280, %305, %cst_123 {dimension_numbers = #tpu.dot_dimension_numbers<[1], [0], [0], [1], [0, 0, 1, 1], [], []>} : vector<1x32xf32>, vector<32x128xf32>, vector<1x128xf32> -> vector<1x128xf32>
    %307 = arith.addf %303, %306 : vector<1x128xf32>
    %c1_124 = arith.constant 1 : index
    %c0_125 = arith.constant 0 : index
    %c0_126 = arith.constant 0 : index
    %308 = vector.load %arg4[%c1_124, %c0_125, %c0_126] : memref<2x1x128xf32, #tpu.memory_space<vmem>>, vector<1x1x128xf32>
    %309 = vector.shape_cast %308 : vector<1x1x128xf32> to vector<1x128xf32>
    %310 = arith.addf %307, %309 : vector<1x128xf32>
    %311 = arith.negf %310 : vector<1x128xf32>
    %312 = math.exp %311 : vector<1x128xf32>
    %cst_127 = arith.constant 1.000000e+00 : f32
    %313 = vector.broadcast %cst_127 : f32 to vector<1x128xf32>
    %314 = arith.addf %313, %312 : vector<1x128xf32>
    %315 = arith.divf %313, %314 : vector<1x128xf32>
    %316 = math.tanh %310 : vector<1x128xf32>
    %317 = vector.extract_strided_slice %315 {offsets = [0, 0], sizes = [1, 32], strides = [1, 1]} : vector<1x128xf32> to vector<1x32xf32>
    %318 = vector.extract_strided_slice %315 {offsets = [0, 32], sizes = [1, 32], strides = [1, 1]} : vector<1x128xf32> to vector<1x32xf32>
    %319 = vector.extract_strided_slice %316 {offsets = [0, 64], sizes = [1, 32], strides = [1, 1]} : vector<1x128xf32> to vector<1x32xf32>
    %320 = vector.extract_strided_slice %315 {offsets = [0, 96], sizes = [1, 32], strides = [1, 1]} : vector<1x128xf32> to vector<1x32xf32>
    %321 = arith.mulf %318, %278 : vector<1x32xf32>
    %322 = arith.mulf %317, %319 : vector<1x32xf32>
    %323 = arith.addf %321, %322 : vector<1x32xf32>
    %324 = math.tanh %323 : vector<1x32xf32>
    %325 = arith.mulf %320, %324 : vector<1x32xf32>
    %326 = vector.extract_strided_slice %6 {offsets = [7, 0], sizes = [1, 128], strides = [1, 1]} : vector<8x128xf32> to vector<1x128xf32>
    %c0_128 = arith.constant 0 : index
    %c0_129 = arith.constant 0 : index
    %c0_130 = arith.constant 0 : index
    %327 = vector.load %arg3[%c0_128, %c0_129, %c0_130] : memref<2x32x128xf32, #tpu.memory_space<vmem>>, vector<1x32x128xf32>
    %328 = vector.shape_cast %327 : vector<1x32x128xf32> to vector<32x128xf32>
    %cst_131 = arith.constant dense<0.000000e+00> : vector<1x128xf32>
    %329 = tpu.matmul %300, %328, %cst_131 {dimension_numbers = #tpu.dot_dimension_numbers<[1], [0], [0], [1], [0, 0, 1, 1], [], []>} : vector<1x32xf32>, vector<32x128xf32>, vector<1x128xf32> -> vector<1x128xf32>
    %330 = arith.addf %326, %329 : vector<1x128xf32>
    %331 = arith.negf %330 : vector<1x128xf32>
    %332 = math.exp %331 : vector<1x128xf32>
    %cst_132 = arith.constant 1.000000e+00 : f32
    %333 = vector.broadcast %cst_132 : f32 to vector<1x128xf32>
    %334 = arith.addf %333, %332 : vector<1x128xf32>
    %335 = arith.divf %333, %334 : vector<1x128xf32>
    %336 = math.tanh %330 : vector<1x128xf32>
    %337 = vector.extract_strided_slice %335 {offsets = [0, 0], sizes = [1, 32], strides = [1, 1]} : vector<1x128xf32> to vector<1x32xf32>
    %338 = vector.extract_strided_slice %335 {offsets = [0, 32], sizes = [1, 32], strides = [1, 1]} : vector<1x128xf32> to vector<1x32xf32>
    %339 = vector.extract_strided_slice %336 {offsets = [0, 64], sizes = [1, 32], strides = [1, 1]} : vector<1x128xf32> to vector<1x32xf32>
    %340 = vector.extract_strided_slice %335 {offsets = [0, 96], sizes = [1, 32], strides = [1, 1]} : vector<1x128xf32> to vector<1x32xf32>
    %341 = arith.mulf %338, %298 : vector<1x32xf32>
    %342 = arith.mulf %337, %339 : vector<1x32xf32>
    %343 = arith.addf %341, %342 : vector<1x32xf32>
    %344 = math.tanh %343 : vector<1x32xf32>
    %345 = arith.mulf %340, %344 : vector<1x32xf32>
    %c0_133 = arith.constant 0 : index
    %c0_134 = arith.constant 0 : index
    %c0_135 = arith.constant 0 : index
    %346 = vector.load %arg2[%c0_133, %c0_134, %c0_135] : memref<1x32x128xf32, #tpu.memory_space<vmem>>, vector<1x32x128xf32>
    %347 = vector.shape_cast %346 : vector<1x32x128xf32> to vector<32x128xf32>
    %cst_136 = arith.constant dense<0.000000e+00> : vector<1x128xf32>
    %348 = tpu.matmul %345, %347, %cst_136 {dimension_numbers = #tpu.dot_dimension_numbers<[1], [0], [0], [1], [0, 0, 1, 1], [], []>} : vector<1x32xf32>, vector<32x128xf32>, vector<1x128xf32> -> vector<1x128xf32>
    %c1_137 = arith.constant 1 : index
    %c0_138 = arith.constant 0 : index
    %c0_139 = arith.constant 0 : index
    %349 = vector.load %arg3[%c1_137, %c0_138, %c0_139] : memref<2x32x128xf32, #tpu.memory_space<vmem>>, vector<1x32x128xf32>
    %350 = vector.shape_cast %349 : vector<1x32x128xf32> to vector<32x128xf32>
    %cst_140 = arith.constant dense<0.000000e+00> : vector<1x128xf32>
    %351 = tpu.matmul %325, %350, %cst_140 {dimension_numbers = #tpu.dot_dimension_numbers<[1], [0], [0], [1], [0, 0, 1, 1], [], []>} : vector<1x32xf32>, vector<32x128xf32>, vector<1x128xf32> -> vector<1x128xf32>
    %352 = arith.addf %348, %351 : vector<1x128xf32>
    %c1_141 = arith.constant 1 : index
    %c0_142 = arith.constant 0 : index
    %c0_143 = arith.constant 0 : index
    %353 = vector.load %arg4[%c1_141, %c0_142, %c0_143] : memref<2x1x128xf32, #tpu.memory_space<vmem>>, vector<1x1x128xf32>
    %354 = vector.shape_cast %353 : vector<1x1x128xf32> to vector<1x128xf32>
    %355 = arith.addf %352, %354 : vector<1x128xf32>
    %356 = arith.negf %355 : vector<1x128xf32>
    %357 = math.exp %356 : vector<1x128xf32>
    %cst_144 = arith.constant 1.000000e+00 : f32
    %358 = vector.broadcast %cst_144 : f32 to vector<1x128xf32>
    %359 = arith.addf %358, %357 : vector<1x128xf32>
    %360 = arith.divf %358, %359 : vector<1x128xf32>
    %361 = math.tanh %355 : vector<1x128xf32>
    %362 = vector.extract_strided_slice %360 {offsets = [0, 0], sizes = [1, 32], strides = [1, 1]} : vector<1x128xf32> to vector<1x32xf32>
    %363 = vector.extract_strided_slice %360 {offsets = [0, 32], sizes = [1, 32], strides = [1, 1]} : vector<1x128xf32> to vector<1x32xf32>
    %364 = vector.extract_strided_slice %361 {offsets = [0, 64], sizes = [1, 32], strides = [1, 1]} : vector<1x128xf32> to vector<1x32xf32>
    %365 = vector.extract_strided_slice %360 {offsets = [0, 96], sizes = [1, 32], strides = [1, 1]} : vector<1x128xf32> to vector<1x32xf32>
    %366 = arith.mulf %363, %323 : vector<1x32xf32>
    %367 = arith.mulf %362, %364 : vector<1x32xf32>
    %368 = arith.addf %366, %367 : vector<1x32xf32>
    %369 = math.tanh %368 : vector<1x32xf32>
    %370 = arith.mulf %365, %369 : vector<1x32xf32>
    %c0_145 = arith.constant 0 : index
    %c0_146 = arith.constant 0 : index
    %371 = vector.load %arg5[%c0_145, %c0_146] : memref<1x32xf32, #tpu.memory_space<vmem>>, vector<1x32xf32>
    %372 = arith.mulf %370, %371 : vector<1x32xf32>
    %cst_147 = arith.constant dense<0.000000e+00> : vector<1xf32>
    %373 = vector.multi_reduction <add>, %372, %cst_147 [1] : vector<1x32xf32> to vector<1xf32>
    %374 = vector.shape_cast %373 : vector<1xf32> to vector<1x1xf32>
    %c0_148 = arith.constant 0 : index
    %c0_149 = arith.constant 0 : index
    %375 = vector.load %arg6[%c0_148, %c0_149] : memref<1x1xf32, #tpu.memory_space<vmem>>, vector<1x1xf32>
    %376 = arith.addf %374, %375 : vector<1x1xf32>
    %c0_150 = arith.constant 0 : index
    %c0_151 = arith.constant 0 : index
    %377 = vector.load %arg7[%c0_150, %c0_151] : memref<1x1xf32, #tpu.memory_space<vmem>>, vector<1x1xf32>
    tpu.vector_store %arg7[%c0_150, %c0_151], %376 {strides = array<i32>} : memref<1x1xf32, #tpu.memory_space<vmem>>, vector<1x1xf32>,
    return
  }
}

</mosaic_0001>

<bundles_post_ra>
// kernel: tpu_custom_call.1
= control target key start
LH: loop header
LB: loop body
LE: loop exit
PB: predicated region body
PF: predicated region fallthrough
CT: control target
= control target key end

     0   :  { %s3618_s0 = inlined_call_operand.vmem [shape: f32[8,4], index: 0, kind: input, shape index: {}]   ;;  %s3619_s1 = inlined_call_operand.vmem [shape: f32[4,128], index: 1, kind: input, shape index: {}]   ;;  %s3620_s2 = inlined_call_operand.hbm [shape: f32[1,32,128], index: 2, kind: input, shape index: {}]   ;;  %s3621_s3 = inlined_call_operand.hbm [shape: f32[2,32,128], index: 3, kind: input, shape index: {}]   ;;  %s3622_s4 = inlined_call_operand.vmem [shape: f32[2,1,128], index: 4, kind: input, shape index: {}]   ;;  %s3623_s5 = inlined_call_operand.vmem [shape: f32[1,32], index: 5, kind: input, shape index: {}]   ;;  %s3624_s6 = inlined_call_operand.<no memory space> [shape: f32[1,1], index: 6, kind: input, shape index: {}]   ;;  %s3625_s7 = inlined_call_operand.hbm [shape: f32[1,1], index: 7, kind: output, shape index: {}]  }
   0x1   :  { %v12_v0 = vstv %s3624_s6 }
   0x2   :  { %13 = vst [vmem:[#allocation2] sm:$0x1] %v12_v0 }
   0x3   :  { %14 = vsyncpa [#allocation4], 0 }
   0x4   :  { %15 = vsyncpa [#allocation7], 0 }
   0x5   :  { %16 = vsyncpa [#allocation5], 0  ;;  %s3194_s26 = smov [#allocation3]   ;;  %s3122_s30 = scalar_lea.hbm %s3620_s2, 512 }
   0x6   :  { %s26_s27 = sshll.u32 %s3194_s26, 4  ;;  %p3123_p0 = scmp.ne.s32.totalorder %s3620_s2, %s3122_s30  ;;  %s27_s27 = int_to_ptr.vmem [resolvable:$true] %s26_s27 }
   0x7   :  { %p3126_p1 = scmp.lt.u32.totalorder %s3122_s30, %s3620_s2 }
   0x9   :  { %p3128_p2 = pnand %p3126_p1, %p3123_p0 }
   0xb   :  { %3131 = shalt.err (!%p3128_p2)
}
   0xc   :  { %s3132_s6 = scalar_lea.vmem %s27_s27, 512  ;;  %p3137_p4 = scmp.lt.s32.totalorder %s27_s27, %s27_s27 }
   0xd   :  { %p3133_p3 = scmp.ne.s32.totalorder %s27_s27, %s3132_s6  ;;  %p3138_p5 = scmp.lt.s32.totalorder %s3132_s6, %s3132_s6 }
   0xf   :  { %p3139_p6 = por %p3138_p5, %p3137_p4 }
  0x11   :  { %p3140_p7 = pnand %p3139_p6, %p3133_p3 }
  0x13   :  { %3143 = shalt.err (!%p3140_p7)
}
  0x14   :  { %s3195_s12 = smov 128   ;;  %s3196_s13 = smov 8  }
  0x15   :  { %32 = dma.hbm_to_vmem [thread:$0]  %s3620_s2, 512, %s27_s27, [#allocation4], %s3195_s12, %s3195_s12, %s3196_s13  }
  0x16   :  { %s3197_s16 = smov [#allocation6]   ;;  %s3144_s20 = scalar_lea.hbm %s3621_s3, 1024 }
  0x17   :  { %s38_s17 = sshll.u32 %s3197_s16, 4  ;;  %p3145_p8 = scmp.ne.s32.totalorder %s3621_s3, %s3144_s20  ;;  %s39_s17 = int_to_ptr.vmem [resolvable:$true] %s38_s17 }
  0x18   :  { %p3148_p9 = scmp.lt.u32.totalorder %s3144_s20, %s3621_s3 }
  0x1a   :  { %p3150_p10 = pnand %p3148_p9, %p3145_p8 }
  0x1c   :  { %3153 = shalt.err (!%p3150_p10)
}
  0x1d   :  { %s3154_s25 = scalar_lea.vmem %s39_s17, 1024  ;;  %p3159_p12 = scmp.lt.s32.totalorder %s39_s17, %s39_s17 }
  0x1e   :  { %p3155_p11 = scmp.ne.s32.totalorder %s39_s17, %s3154_s25  ;;  %p3160_p13 = scmp.lt.s32.totalorder %s3154_s25, %s3154_s25 }
  0x20   :  { %p3161_p0 = por %p3160_p13, %p3159_p12 }
  0x22   :  { %p3162_p1 = pnand %p3161_p0, %p3155_p11 }
  0x24   :  { %3165 = shalt.err (!%p3162_p1)
}
  0x25   :  { %44 = dma.hbm_to_vmem [thread:$0]  %s3621_s3, 1024, %s39_s17, [#allocation7], %s3195_s12, %s3195_s12, %s3196_s13  }
  0x26   :  { %3188 = dma.done.wait [#allocation4], 512  }
  0x27   :  { %3189 = vsyncadd [#allocation4], 4294966784 }
  0x28   :  { %3190 = dma.done.wait [#allocation7], 1024  }
  0x29   :  { %3191 = vsyncadd [#allocation7], 4294966272  ;;  %v3198_v1 = vmov 0.0|0.0   ;;  %v3199_v2 = vmov 0.0   ;;  %vm3200_vm0 = vmmov 0   ;;  %vm70_vm1 = vcmask 1043456  }
  0x2a   :  { %2839 = vmatprep.subr.bf16.mxu1 %v3198_v1  ;;  %2570 = vmatprep.subr.mxu0 %v3199_v2  ;;  %vm66_vm2 = vcmask 31744   ;;  %v144_v3 = vld [vmem:[#allocation6] sm:$0xff]  ;;  %v145_v4 = vld [vmem:[#allocation6 + $0x8] sm:$0xff]  ;;  %v146_v8 = vld [vmem:[#allocation6 + $0x10] sm:$0xff]  ;;  %s3201_s30 = smov 64   ;;  %s3202_s8 = smov 32  }
  0x2b   :  { %2572 = vmatprep.mubr.msk.f32.mxu0 %vm3200_vm0, %v3199_v2  ;;  %2583 = vmatprep.mubr.msk.f32.mxu1 %vm3200_vm0, %v3199_v2  ;;  %v58_v5 = vld [vmem:[%s3619_s1] sm:$0xf]  ;;  %v3281_v6 = vpack.c.bf16 %v145_v4, %v144_v3  ;;  %v253_v29 = vld [vmem:[#allocation6 + $0x28] sm:$0xff]  ;;  %v254_v30 = vld [vmem:[#allocation6 + $0x30] sm:$0xff]  ;;  %vm148_vm3 = vcmask 261120   ;;  %s3203_s6 = smov 96  }
  0x2c   :  { %2571 = vmatpush3.msk.msra.mxu0 %vm70_vm1, %v58_v5  ;;  %v57_v7 = vld [vmem:[%s3618_s0] sm:$0xff]  ;;  %v248_v34 = vld [vmem:[#allocation3 + $0x8] sm:$0xff]  ;;  %v249_v36 = vld [vmem:[#allocation3 + $0x10] sm:$0xff]  ;;  %vm2381_vm4 = vcmask 253952   ;;  %vm2387_vm5 = vcmask 0  }
  0x2d   :  { %v147_v9 = vld [vmem:[#allocation6 + $0x18] sm:$0xff]  ;;  %2573 = vmatmul.mubr.msk.f32.vlgmr.msra.gmra.mrb[0].mxu0 %vm66_vm2, %v57_v7  ;;  %2845 = vmatprep.subr.bf16.mxu0 %v3198_v1  ;;  %v252_v28 = vld [vmem:[#allocation6 + $0x20] sm:$0xff] }
  0x2e   :  { %2841 = vmatpush3.bf16.msra.mxu1 %v3281_v6  ;;  %v3288_v10 = vpack.c.bf16 %v147_v9, %v146_v8  ;;  %2594 = vmatprep.mubr.msk.f32.mxu0 %vm3200_vm0, %v3199_v2  ;;  %v2405_v13 = vld [vmem:[%s3622_s4] ss:$0 sm:$0xff]  ;;  %v3309_v31 = vpack.c.bf16 %v253_v29, %v252_v28  ;;  %v247_v33 = vld [vmem:[#allocation3] sm:$0xff] }
  0x2f   :  { %2842 = vmatprep.subr.bf16.mxu1 %v3198_v1  ;;  %v255_v32 = vld [vmem:[#allocation6 + $0x38] sm:$0xff]  ;;  %v3311_v35 = vpack.c.bf16 %v248_v34, %v247_v33  ;;  %v3351_v47 = vld [vmem:[%s3622_s4 + $0x1] sm:$0x1] }
  0x30   :  { %v250_v37 = vld [vmem:[#allocation3 + $0x18] sm:$0xff]  ;;  %2847 = vmatpush3.bf16.msra.mxu0 %v3309_v31  ;;  %v3314_v38 = vpack.c.bf16 %v255_v32, %v254_v30 }
  0x31   :  { %2848 = vmatprep.subr.bf16.mxu0 %v3198_v1  ;;  %v3318_v39 = vpack.c.bf16 %v250_v37, %v249_v36 }
  0x32   :  { %2844 = vmatpush3.bf16.msra.mxu1 %v3288_v10 }
  0x33   :  { %2851 = vmatprep.subr.bf16.mxu1 %v3198_v1 }
  0x34   :  { %2850 = vmatpush3.bf16.msra.mxu0 %v3314_v38 }
  0x35   :  { %2584 = vmatmul.mubr.f32.vlgmr.msra.gmra.mrb[0].mxu1 %v3199_v2  ;;  %2857 = vmatprep.subr.bf16.mxu0 %v3198_v1 }
  0x36   :  { %2605 = vmatprep.mubr.msk.f32.mxu1 %vm3200_vm0, %v3199_v2  ;;  %2853 = vmatpush3.bf16.msra.mxu1 %v3311_v35 }
  0x37   :  { %2854 = vmatprep.subr.bf16.mxu1 %v3198_v1  ;;  %2595 = vmatmul.mubr.f32.vlgmr.msra.gmra.mrb[2].mxu0 %v3199_v2 }
  0x38   :  { %2859 = vmatpush3.bf16.msra.mxu0 %v3281_v6  ;;  %2616 = vmatprep.mubr.msk.f32.mxu0 %vm3200_vm0, %v3199_v2 }
  0x39   :  { %2860 = vmatprep.subr.bf16.mxu0 %v3198_v1 }
  0x3a   :  { %2856 = vmatpush3.bf16.msra.mxu1 %v3318_v39 }
  0x3b   :  { %2863 = vmatprep.subr.bf16.mxu1 %v3198_v1 }
  0x3c   :  { %2862 = vmatpush3.bf16.msra.mxu0 %v3288_v10 }
  0x3d   :  { %2869 = vmatprep.subr.bf16.mxu0 %v3198_v1 }
 0x100   :  { %v140_v11 = vpop.f32.mrb[0].mxu0 }
 0x101   :  { %v2574_v12 = vpop.f32.mrb[1].mxu0  ;;  %v3301_v14 = vadd.f32 %v2405_v13, %v140_v11 }
 0x108   :  { %v218_v15 = vpop.f32.mrb[0].mxu1 }
 0x109   :  { %v222_v16 = vadd.f32 %v218_v15, %v3301_v14  ;;  %v2585_v17 = vpop.f32.mrb[1].mxu1 }
 0x10a   :  { %v322_v43 = vpop.f32.mrb[2].mxu0 }
 0x10b   :  { %2994 = vtanh.f32 %v222_v16  ;;  %v2408_v19 = vmul.f32 -1.442695, %v222_v16  ;;  %v2596_v44 = vpop.f32.mrb[3].mxu0 }
 0x10d   :  { %2996 = vpow2.f32 %v2408_v19 }
 0x115   :  { %v2995_v18 = vpop.eup %2994 }
 0x116   :  { %232 = vrot.lane.b32.xlu0 %v2995_v18, %s3201_s30 }
 0x117   :  { %v2997_v20 = vpop.eup %2996 }
 0x118   :  { %v226_v21 = vadd.f32 1.0, %v2997_v20 }
 0x11a   :  { %2998 = vrcp.f32 %v226_v21 }
 0x124   :  { %v2999_v22 = vpop.eup %2998 }
 0x125   :  { %v230_v25 = vmul.f32 0.0, %v2999_v22 }
 0x188   :  { %v233_v23 = vpop.permute.xlu0 %232 }
 0x189   :  { %v235_v24 = vmul.f32 %v2999_v22, %v233_v23 }
 0x18b   :  { %237 = vrot.lane.b32.xlu0 %v235_v24, %s3202_s8 }
 0x1fd   :  { %v238_v26 = vpop.permute.xlu0 %237 }
 0x1fe   :  { %v3306_v27 = vadd.f32 %v238_v26, %v230_v25 }
 0x200   :  { %3000 = vtanh.f32 %v3306_v27  ;;  %v510_v8 = vrot.slane %v3306_v27, 7 }
 0x20a   :  { %v3001_v40 = vpop.eup %3000 }
 0x20b   :  { %243 = vrot.lane.b32.xlu1 %v3001_v40, %s3201_s30 }
 0x27d   :  { %v244_v41 = vpop.permute.xlu1 %243 }
 0x27e   :  { %v246_v42 = vmul.f32 %v2999_v22, %v244_v41 }
 0x280   :  { %327 = vrot.lane.b32.xlu1 %v246_v42, %s3202_s8 }
 0x2f2   :  { %v328_v45 = vpop.permute.xlu1 %327 }
 0x2f3   :  { %2606 = vmatmul.mubr.msk.f32.vlgmr.msra.gmra.mrb[2].mxu1 %vm148_vm3, %v328_v45  ;;  %2617 = vmatmul.mubr.msk.f32.vlgmr.msra.gmra.mrb[4].mxu0 %vm148_vm3, %v328_v45 }
 0x2f4   :  { %2865 = vmatpush3.bf16.msra.mxu1 %v3309_v31  ;;  %2871 = vmatpush3.bf16.msra.mxu0 %v3311_v35 }
 0x2f5   :  { %2866 = vmatprep.subr.bf16.mxu1 %v3198_v1  ;;  %2872 = vmatprep.subr.bf16.mxu0 %v3198_v1 }
 0x2f6   :  { %2627 = vmatprep.mubr.msk.f32.mxu1 %vm3200_vm0, %v3199_v2  ;;  %2638 = vmatprep.mubr.msk.f32.mxu0 %vm3200_vm0, %v3199_v2 }
 0x2f8   :  { %2868 = vmatpush3.bf16.msra.mxu1 %v3314_v38  ;;  %2874 = vmatpush3.bf16.msra.mxu0 %v3318_v39 }
 0x2f9   :  { %2875 = vmatprep.subr.bf16.mxu1 %v3198_v1  ;;  %2881 = vmatprep.subr.bf16.mxu0 %v3198_v1 }
 0x3c6   :  { %v397_v46 = vpop.f32.mrb[2].mxu1  ;;  %v494_v48 = vpop.f32.mrb[4].mxu0 }
 0x3c7   :  { %v398_v49 = vadd.f32 %v397_v46, %v322_v43  ;;  %v499_v50 = vrot.slane %v494_v48, 7  ;;  %v2607_v51 = vpop.f32.mrb[3].mxu1  ;;  %v2618_v52 = vpop.f32.mrb[5].mxu0 }
 0x3c9   :  { %v403_v53 = vadd.f32 %v3351_v47, %v398_v49  ;;  %v501_v54 = vadd.f32 %v499_v50, %v3301_v14 }
 0x3cb   :  { %3002 = vtanh.f32 %v403_v53  ;;  %v2411_v57 = vmul.f32 -1.442695, %v403_v53  ;;  %v2413_v58 = vmul.f32 -1.442695, %v501_v54 }
 0x3cc   :  { %3004 = vtanh.f32 %v501_v54 }
 0x3cd   :  { %3006 = vpow2.f32 %v2411_v57 }
 0x3ce   :  { %3008 = vpow2.f32 %v2413_v58 }
 0x3d5   :  { %v3003_v55 = vpop.eup %3002 }
 0x3d6   :  { %v3005_v56 = vpop.eup %3004  ;;  %413 = vrot.lane.b32.xlu0 %v3003_v55, %s3201_s30 }
 0x3d7   :  { %514 = vrot.lane.b32.xlu1 %v3005_v56, %s3201_s30  ;;  %v3007_v59 = vpop.eup %3006 }
 0x3d8   :  { %v3009_v60 = vpop.eup %3008  ;;  %v407_v61 = vadd.f32 1.0, %v3007_v59 }
 0x3d9   :  { %v505_v62 = vadd.f32 1.0, %v3009_v60 }
 0x3da   :  { %3010 = vrcp.f32 %v407_v61 }
 0x3db   :  { %3012 = vrcp.f32 %v505_v62 }
 0x3e4   :  { %v3011_v63 = vpop.eup %3010 }
 0x3e5   :  { %v3013_v3 = vpop.eup %3012  ;;  %v411_v9 = vmul.f32 0.0, %v3011_v63 }
 0x3e6   :  { %v512_v12 = vmul.f32 %v3013_v3, %v510_v8 }
 0x448   :  { %v414_v0 = vpop.permute.xlu0 %413 }
 0x449   :  { %v416_v4 = vmul.f32 %v3011_v63, %v414_v0  ;;  %v515_v5 = vpop.permute.xlu1 %514 }
 0x44a   :  { %v517_v7 = vmul.f32 %v3013_v3, %v515_v5 }
 0x44b   :  { %418 = vrot.lane.b32.xlu0 %v416_v4, %s3202_s8 }
 0x44c   :  { %519 = vrot.lane.b32.xlu1 %v517_v7, %s3202_s8 }
 0x4bd   :  { %v419_v11 = vpop.permute.xlu0 %418 }
 0x4be   :  { %v3360_v13 = vadd.f32 %v419_v11, %v411_v9  ;;  %v520_v15 = vpop.permute.xlu1 %519 }
 0x4bf   :  { %v3362_v16 = vadd.f32 %v520_v15, %v512_v12 }
 0x4c0   :  { %3014 = vtanh.f32 %v3360_v13 }
 0x4c1   :  { %3016 = vtanh.f32 %v3362_v16  ;;  %v787_v58 = vrot.slane %v3362_v16, 7 }
 0x4ca   :  { %v3015_v17 = vpop.eup %3014 }
 0x4cb   :  { %v3017_v18 = vpop.eup %3016  ;;  %424 = vrot.lane.b32.xlu0 %v3015_v17, %s3201_s30 }
 0x4cc   :  { %525 = vrot.lane.b32.xlu1 %v3017_v18, %s3201_s30 }
 0x53d   :  { %v425_v19 = vpop.permute.xlu0 %424 }
 0x53e   :  { %v427_v20 = vmul.f32 %v3011_v63, %v425_v19  ;;  %v526_v21 = vpop.permute.xlu1 %525 }
 0x53f   :  { %v528_v22 = vmul.f32 %v3013_v3, %v526_v21 }
 0x540   :  { %530 = vrot.lane.b32.xlu0 %v427_v20, %s3202_s8 }
 0x541   :  { %v605_v23 = vrot.slane %v528_v22, 1 }
 0x543   :  { %606 = vrot.lane.b32.xlu1 %v605_v23, %s3202_s8 }
 0x5b2   :  { %v531_v24 = vpop.permute.xlu0 %530 }
 0x5b3   :  { %2628 = vmatmul.mubr.msk.f32.vlgmr.msra.gmra.mrb[4].mxu1 %vm148_vm3, %v531_v24 }
 0x5b4   :  { %2877 = vmatpush3.bf16.msra.mxu1 %v3281_v6  ;;  %2649 = vmatprep.mubr.msk.f32.mxu1 %vm3200_vm0, %v3199_v2 }
 0x5b5   :  { %v607_v25 = vpop.permute.xlu1 %606  ;;  %2878 = vmatprep.subr.bf16.mxu1 %v3198_v1 }
 0x5b6   :  { %2639 = vmatmul.mubr.msk.f32.vlgmr.msra.gmra.mrb[6].mxu0 %vm148_vm3, %v607_v25 }
 0x5b7   :  { %2883 = vmatpush3.bf16.msra.mxu0 %v3309_v31  ;;  %2660 = vmatprep.mubr.msk.f32.mxu0 %vm3200_vm0, %v3199_v2 }
 0x5b8   :  { %2880 = vmatpush3.bf16.msra.mxu1 %v3288_v10  ;;  %2884 = vmatprep.subr.bf16.mxu0 %v3198_v1 }
 0x5b9   :  { %2887 = vmatprep.subr.bf16.mxu1 %v3198_v1 }
 0x5bb   :  { %2650 = vmatmul.mubr.msk.f32.vlgmr.msra.gmra.mrb[6].mxu1 %vm148_vm3, %v607_v25  ;;  %2886 = vmatpush3.bf16.msra.mxu0 %v3314_v38 }
 0x5bc   :  { %2893 = vmatprep.subr.bf16.mxu0 %v3198_v1  ;;  %2889 = vmatpush3.bf16.msra.mxu1 %v3311_v35 }
 0x5bd   :  { %2890 = vmatprep.subr.bf16.mxu1 %v3198_v1  ;;  %2671 = vmatprep.mubr.msk.f32.mxu1 %vm3200_vm0, %v3199_v2 }
 0x5c0   :  { %2892 = vmatpush3.bf16.msra.mxu1 %v3318_v39 }
 0x5c1   :  { %2899 = vmatprep.subr.bf16.mxu1 %v3198_v1 }
 0x686   :  { %v600_v26 = vpop.f32.mrb[4].mxu1 }
 0x687   :  { %v2629_v27 = vpop.f32.mrb[5].mxu1 }
 0x689   :  { %v676_v28 = vpop.f32.mrb[6].mxu0 }
 0x68a   :  { %v677_v29 = vadd.f32 %v676_v28, %v600_v26  ;;  %v2640_v30 = vpop.f32.mrb[7].mxu0 }
 0x68c   :  { %v680_v32 = vadd.f32 %v3351_v47, %v677_v29 }
 0x68e   :  { %3018 = vtanh.f32 %v680_v32  ;;  %v771_v33 = vpop.f32.mrb[6].mxu1  ;;  %v2416_v42 = vmul.f32 -1.442695, %v680_v32 }
 0x68f   :  { %v776_v34 = vrot.slane %v771_v33, 6  ;;  %v2651_v36 = vpop.f32.mrb[7].mxu1 }
 0x691   :  { %v778_v37 = vadd.f32 %v776_v34, %v3301_v14 }
 0x693   :  { %3020 = vtanh.f32 %v778_v37  ;;  %v2418_v43 = vmul.f32 -1.442695, %v778_v37 }
 0x694   :  { %3022 = vpow2.f32 %v2416_v42 }
 0x695   :  { %3024 = vpow2.f32 %v2418_v43 }
 0x698   :  { %v3019_v40 = vpop.eup %3018 }
 0x699   :  { %690 = vrot.lane.b32.xlu0 %v3019_v40, %s3201_s30 }
 0x69d   :  { %v3021_v41 = vpop.eup %3020 }
 0x69e   :  { %791 = vrot.lane.b32.xlu1 %v3021_v41, %s3201_s30  ;;  %v3023_v44 = vpop.eup %3022 }
 0x69f   :  { %v684_v45 = vadd.f32 1.0, %v3023_v44  ;;  %v3025_v46 = vpop.eup %3024 }
 0x6a0   :  { %v782_v48 = vadd.f32 1.0, %v3025_v46 }
 0x6a1   :  { %3026 = vrcp.f32 %v684_v45 }
 0x6a2   :  { %3028 = vrcp.f32 %v782_v48 }
 0x6ab   :  { %v3027_v49 = vpop.eup %3026 }
 0x6ac   :  { %v3029_v52 = vpop.eup %3028  ;;  %v688_v55 = vmul.f32 %v3027_v49, %v3360_v13 }
 0x6ad   :  { %v789_v59 = vmul.f32 %v3029_v52, %v787_v58 }
 0x70b   :  { %v691_v50 = vpop.permute.xlu0 %690 }
 0x70c   :  { %v693_v51 = vmul.f32 %v3027_v49, %v691_v50 }
 0x70e   :  { %695 = vrot.lane.b32.xlu0 %v693_v51, %s3202_s8 }
 0x710   :  { %v792_v53 = vpop.permute.xlu1 %791 }
 0x711   :  { %v794_v54 = vmul.f32 %v3029_v52, %v792_v53 }
 0x713   :  { %796 = vrot.lane.b32.xlu1 %v794_v54, %s3202_s8 }
 0x780   :  { %v696_v56 = vpop.permute.xlu0 %695 }
 0x781   :  { %v3398_v57 = vadd.f32 %v696_v56, %v688_v55 }
 0x783   :  { %3030 = vtanh.f32 %v3398_v57 }
 0x785   :  { %v797_v60 = vpop.permute.xlu1 %796 }
 0x786   :  { %v3402_v61 = vadd.f32 %v797_v60, %v789_v59 }
 0x788   :  { %3032 = vtanh.f32 %v3402_v61  ;;  %v1064_v40 = vrot.slane %v3402_v61, 7 }
 0x78d   :  { %v3031_v62 = vpop.eup %3030 }
 0x78e   :  { %701 = vrot.lane.b32.xlu0 %v3031_v62, %s3201_s30 }
 0x792   :  { %v3033_v63 = vpop.eup %3032 }
 0x793   :  { %802 = vrot.lane.b32.xlu1 %v3033_v63, %s3201_s30 }
 0x800   :  { %v702_v0 = vpop.permute.xlu0 %701 }
 0x801   :  { %v704_v3 = vmul.f32 %v3027_v49, %v702_v0 }
 0x803   :  { %807 = vrot.lane.b32.xlu0 %v704_v3, %s3202_s8 }
 0x805   :  { %v803_v4 = vpop.permute.xlu1 %802 }
 0x806   :  { %v805_v5 = vmul.f32 %v3029_v52, %v803_v4 }
 0x808   :  { %v882_v7 = vrot.slane %v805_v5, 2 }
 0x80a   :  { %883 = vrot.lane.b32.xlu1 %v882_v7, %s3202_s8 }
 0x875   :  { %v808_v8 = vpop.permute.xlu0 %807 }
 0x876   :  { %2661 = vmatmul.mubr.msk.f32.vlgmr.msra.gmra.mrb[8].mxu0 %vm148_vm3, %v808_v8 }
 0x877   :  { %2895 = vmatpush3.bf16.msra.mxu0 %v3281_v6  ;;  %2682 = vmatprep.mubr.msk.f32.mxu0 %vm3200_vm0, %v3199_v2 }
 0x878   :  { %2896 = vmatprep.subr.bf16.mxu0 %v3198_v1 }
 0x87b   :  { %2898 = vmatpush3.bf16.msra.mxu0 %v3288_v10 }
 0x87c   :  { %v884_v9 = vpop.permute.xlu1 %883  ;;  %2905 = vmatprep.subr.bf16.mxu0 %v3198_v1 }
 0x87d   :  { %2672 = vmatmul.mubr.msk.f32.vlgmr.msra.gmra.mrb[8].mxu1 %vm148_vm3, %v884_v9 }
 0x87e   :  { %2683 = vmatmul.mubr.msk.f32.vlgmr.msra.gmra.mrb[10].mxu0 %vm148_vm3, %v884_v9  ;;  %2901 = vmatpush3.bf16.msra.mxu1 %v3309_v31 }
 0x87f   :  { %2902 = vmatprep.subr.bf16.mxu1 %v3198_v1  ;;  %2907 = vmatpush3.bf16.msra.mxu0 %v3311_v35 }
 0x880   :  { %2908 = vmatprep.subr.bf16.mxu0 %v3198_v1  ;;  %2693 = vmatprep.mubr.msk.f32.mxu1 %vm3200_vm0, %v3199_v2 }
 0x881   :  { %2704 = vmatprep.mubr.msk.f32.mxu0 %vm3200_vm0, %v3199_v2 }
 0x882   :  { %2904 = vmatpush3.bf16.msra.mxu1 %v3314_v38 }
 0x883   :  { %2910 = vmatpush3.bf16.msra.mxu0 %v3318_v39  ;;  %2911 = vmatprep.subr.bf16.mxu1 %v3198_v1 }
 0x884   :  { %2917 = vmatprep.subr.bf16.mxu0 %v3198_v1 }
 0x949   :  { %v877_v11 = vpop.f32.mrb[8].mxu0 }
 0x94a   :  { %v2662_v12 = vpop.f32.mrb[9].mxu0 }
 0x950   :  { %v953_v13 = vpop.f32.mrb[8].mxu1 }
 0x951   :  { %v954_v15 = vadd.f32 %v953_v13, %v877_v11  ;;  %v1048_v16 = vpop.f32.mrb[10].mxu0  ;;  %v2673_v17 = vpop.f32.mrb[9].mxu1 }
 0x952   :  { %v1053_v18 = vrot.slane %v1048_v16, 5  ;;  %v2684_v19 = vpop.f32.mrb[11].mxu0 }
 0x953   :  { %v957_v20 = vadd.f32 %v3351_v47, %v954_v15 }
 0x954   :  { %v1055_v21 = vadd.f32 %v1053_v18, %v3301_v14 }
 0x955   :  { %3034 = vtanh.f32 %v957_v20  ;;  %v2421_v24 = vmul.f32 -1.442695, %v957_v20 }
 0x956   :  { %3036 = vtanh.f32 %v1055_v21  ;;  %v2423_v25 = vmul.f32 -1.442695, %v1055_v21 }
 0x957   :  { %3038 = vpow2.f32 %v2421_v24 }
 0x958   :  { %3040 = vpow2.f32 %v2423_v25 }
 0x95f   :  { %v3035_v22 = vpop.eup %3034 }
 0x960   :  { %v3037_v23 = vpop.eup %3036  ;;  %967 = vrot.lane.b32.xlu0 %v3035_v22, %s3201_s30 }
 0x961   :  { %1068 = vrot.lane.b32.xlu1 %v3037_v23, %s3201_s30  ;;  %v3039_v26 = vpop.eup %3038 }
 0x962   :  { %v3041_v27 = vpop.eup %3040  ;;  %v961_v28 = vadd.f32 1.0, %v3039_v26 }
 0x963   :  { %v1059_v29 = vadd.f32 1.0, %v3041_v27 }
 0x964   :  { %3042 = vrcp.f32 %v961_v28 }
 0x965   :  { %3044 = vrcp.f32 %v1059_v29 }
 0x96e   :  { %v3043_v30 = vpop.eup %3042 }
 0x96f   :  { %v3045_v33 = vpop.eup %3044  ;;  %v965_v41 = vmul.f32 %v3043_v30, %v3398_v57 }
 0x970   :  { %v1066_v43 = vmul.f32 %v3045_v33, %v1064_v40 }
 0x9d2   :  { %v968_v32 = vpop.permute.xlu0 %967 }
 0x9d3   :  { %v970_v34 = vmul.f32 %v3043_v30, %v968_v32  ;;  %v1069_v36 = vpop.permute.xlu1 %1068 }
 0x9d4   :  { %v1071_v37 = vmul.f32 %v3045_v33, %v1069_v36 }
 0x9d5   :  { %972 = vrot.lane.b32.xlu0 %v970_v34, %s3202_s8 }
 0x9d6   :  { %1073 = vrot.lane.b32.xlu1 %v1071_v37, %s3202_s8 }
 0xa47   :  { %v973_v42 = vpop.permute.xlu0 %972 }
 0xa48   :  { %v3438_v44 = vadd.f32 %v973_v42, %v965_v41  ;;  %v1074_v45 = vpop.permute.xlu1 %1073 }
 0xa49   :  { %v3440_v46 = vadd.f32 %v1074_v45, %v1066_v43 }
 0xa4a   :  { %3046 = vtanh.f32 %v3438_v44 }
 0xa4b   :  { %3048 = vtanh.f32 %v3440_v46  ;;  %v1341_v25 = vrot.slane %v3440_v46, 7 }
 0xa54   :  { %v3047_v48 = vpop.eup %3046 }
 0xa55   :  { %v3049_v49 = vpop.eup %3048  ;;  %978 = vrot.lane.b32.xlu0 %v3047_v48, %s3201_s30 }
 0xa56   :  { %1079 = vrot.lane.b32.xlu1 %v3049_v49, %s3201_s30 }
 0xac7   :  { %v979_v50 = vpop.permute.xlu0 %978 }
 0xac8   :  { %v981_v51 = vmul.f32 %v3043_v30, %v979_v50  ;;  %v1080_v52 = vpop.permute.xlu1 %1079 }
 0xac9   :  { %v1082_v53 = vmul.f32 %v3045_v33, %v1080_v52 }
 0xaca   :  { %1084 = vrot.lane.b32.xlu0 %v981_v51, %s3202_s8 }
 0xacb   :  { %v1159_v54 = vrot.slane %v1082_v53, 3 }
 0xacd   :  { %1160 = vrot.lane.b32.xlu1 %v1159_v54, %s3202_s8 }
 0xb3c   :  { %v1085_v55 = vpop.permute.xlu0 %1084 }
 0xb3d   :  { %2694 = vmatmul.mubr.msk.f32.vlgmr.msra.gmra.mrb[10].mxu1 %vm148_vm3, %v1085_v55 }
 0xb3e   :  { %2913 = vmatpush3.bf16.msra.mxu1 %v3281_v6  ;;  %2715 = vmatprep.mubr.msk.f32.mxu1 %vm3200_vm0, %v3199_v2 }
 0xb3f   :  { %v1161_v56 = vpop.permute.xlu1 %1160  ;;  %2914 = vmatprep.subr.bf16.mxu1 %v3198_v1 }
 0xb40   :  { %2705 = vmatmul.mubr.msk.f32.vlgmr.msra.gmra.mrb[12].mxu0 %vm148_vm3, %v1161_v56 }
 0xb41   :  { %2919 = vmatpush3.bf16.msra.mxu0 %v3309_v31  ;;  %2726 = vmatprep.mubr.msk.f32.mxu0 %vm3200_vm0, %v3199_v2 }
 0xb42   :  { %2916 = vmatpush3.bf16.msra.mxu1 %v3288_v10  ;;  %2920 = vmatprep.subr.bf16.mxu0 %v3198_v1 }
 0xb43   :  { %2923 = vmatprep.subr.bf16.mxu1 %v3198_v1 }
 0xb45   :  { %2716 = vmatmul.mubr.msk.f32.vlgmr.msra.gmra.mrb[12].mxu1 %vm148_vm3, %v1161_v56  ;;  %2922 = vmatpush3.bf16.msra.mxu0 %v3314_v38 }
 0xb46   :  { %2929 = vmatprep.subr.bf16.mxu0 %v3198_v1  ;;  %2925 = vmatpush3.bf16.msra.mxu1 %v3311_v35 }
 0xb47   :  { %2926 = vmatprep.subr.bf16.mxu1 %v3198_v1  ;;  %2737 = vmatprep.mubr.msk.f32.mxu1 %vm3200_vm0, %v3199_v2 }
 0xb4a   :  { %2928 = vmatpush3.bf16.msra.mxu1 %v3318_v39 }
 0xb4b   :  { %2935 = vmatprep.subr.bf16.mxu1 %v3198_v1 }
 0xc10   :  { %v1154_v57 = vpop.f32.mrb[10].mxu1 }
 0xc11   :  { %v2695_v58 = vpop.f32.mrb[11].mxu1 }
 0xc13   :  { %v1230_v59 = vpop.f32.mrb[12].mxu0 }
 0xc14   :  { %v1231_v60 = vadd.f32 %v1230_v59, %v1154_v57  ;;  %v2706_v61 = vpop.f32.mrb[13].mxu0 }
 0xc16   :  { %v1234_v62 = vadd.f32 %v3351_v47, %v1231_v60 }
 0xc18   :  { %3050 = vtanh.f32 %v1234_v62  ;;  %v1325_v63 = vpop.f32.mrb[12].mxu1  ;;  %v2426_v8 = vmul.f32 -1.442695, %v1234_v62 }
 0xc19   :  { %v1330_v0 = vrot.slane %v1325_v63, 4  ;;  %v2717_v3 = vpop.f32.mrb[13].mxu1 }
 0xc1b   :  { %v1332_v4 = vadd.f32 %v1330_v0, %v3301_v14 }
 0xc1d   :  { %3052 = vtanh.f32 %v1332_v4  ;;  %v2428_v9 = vmul.f32 -1.442695, %v1332_v4 }
 0xc1e   :  { %3054 = vpow2.f32 %v2426_v8 }
 0xc1f   :  { %3056 = vpow2.f32 %v2428_v9 }
 0xc22   :  { %v3051_v5 = vpop.eup %3050 }
 0xc23   :  { %1244 = vrot.lane.b32.xlu0 %v3051_v5, %s3201_s30 }
 0xc27   :  { %v3053_v7 = vpop.eup %3052 }
 0xc28   :  { %1345 = vrot.lane.b32.xlu1 %v3053_v7, %s3201_s30  ;;  %v3055_v11 = vpop.eup %3054 }
 0xc29   :  { %v1238_v12 = vadd.f32 1.0, %v3055_v11  ;;  %v3057_v13 = vpop.eup %3056 }
 0xc2a   :  { %v1336_v15 = vadd.f32 1.0, %v3057_v13 }
 0xc2b   :  { %3058 = vrcp.f32 %v1238_v12 }
 0xc2c   :  { %3060 = vrcp.f32 %v1336_v15 }
 0xc35   :  { %v3059_v16 = vpop.eup %3058 }
 0xc36   :  { %v3061_v19 = vpop.eup %3060  ;;  %v1242_v22 = vmul.f32 %v3059_v16, %v3438_v44 }
 0xc37   :  { %v1343_v26 = vmul.f32 %v3061_v19, %v1341_v25 }
 0xc95   :  { %v1245_v17 = vpop.permute.xlu0 %1244 }
 0xc96   :  { %v1247_v18 = vmul.f32 %v3059_v16, %v1245_v17 }
 0xc98   :  { %1249 = vrot.lane.b32.xlu0 %v1247_v18, %s3202_s8 }
 0xc9a   :  { %v1346_v20 = vpop.permute.xlu1 %1345 }
 0xc9b   :  { %v1348_v21 = vmul.f32 %v3061_v19, %v1346_v20 }
 0xc9d   :  { %1350 = vrot.lane.b32.xlu1 %v1348_v21, %s3202_s8 }
 0xd0a   :  { %v1250_v23 = vpop.permute.xlu0 %1249 }
 0xd0b   :  { %v3476_v24 = vadd.f32 %v1250_v23, %v1242_v22 }
 0xd0d   :  { %3062 = vtanh.f32 %v3476_v24 }
 0xd0f   :  { %v1351_v27 = vpop.permute.xlu1 %1350 }
 0xd10   :  { %v3480_v28 = vadd.f32 %v1351_v27, %v1343_v26 }
 0xd12   :  { %3064 = vtanh.f32 %v3480_v28  ;;  %v1618_v5 = vrot.slane %v3480_v28, 7 }
 0xd17   :  { %v3063_v29 = vpop.eup %3062 }
 0xd18   :  { %1255 = vrot.lane.b32.xlu0 %v3063_v29, %s3201_s30 }
 0xd1c   :  { %v3065_v30 = vpop.eup %3064 }
 0xd1d   :  { %1356 = vrot.lane.b32.xlu1 %v3065_v30, %s3201_s30 }
 0xd8a   :  { %v1256_v32 = vpop.permute.xlu0 %1255 }
 0xd8b   :  { %v1258_v33 = vmul.f32 %v3059_v16, %v1256_v32 }
 0xd8d   :  { %1361 = vrot.lane.b32.xlu0 %v1258_v33, %s3202_s8 }
 0xd8f   :  { %v1357_v34 = vpop.permute.xlu1 %1356 }
 0xd90   :  { %v1359_v36 = vmul.f32 %v3061_v19, %v1357_v34 }
 0xd92   :  { %v1436_v37 = vrot.slane %v1359_v36, 4 }
 0xd94   :  { %1437 = vrot.lane.b32.xlu1 %v1436_v37, %s3202_s8 }
 0xdff   :  { %v1362_v40 = vpop.permute.xlu0 %1361 }
 0xe00   :  { %2727 = vmatmul.mubr.msk.f32.vlgmr.msra.gmra.mrb[14].mxu0 %vm148_vm3, %v1362_v40 }
 0xe01   :  { %2931 = vmatpush3.bf16.msra.mxu0 %v3281_v6  ;;  %2748 = vmatprep.mubr.msk.f32.mxu0 %vm3200_vm0, %v3199_v2 }
 0xe02   :  { %2932 = vmatprep.subr.bf16.mxu0 %v3198_v1 }
 0xe05   :  { %2934 = vmatpush3.bf16.msra.mxu0 %v3288_v10 }
 0xe06   :  { %v1438_v41 = vpop.permute.xlu1 %1437  ;;  %2941 = vmatprep.subr.bf16.mxu0 %v3198_v1 }
 0xe07   :  { %2738 = vmatmul.mubr.msk.f32.vlgmr.msra.gmra.mrb[14].mxu1 %vm148_vm3, %v1438_v41 }
 0xe08   :  { %2749 = vmatmul.mubr.msk.f32.vlgmr.msra.gmra.mrb[16].mxu0 %vm148_vm3, %v1438_v41  ;;  %2937 = vmatpush3.bf16.msra.mxu1 %v3309_v31 }
 0xe09   :  { %2938 = vmatprep.subr.bf16.mxu1 %v3198_v1  ;;  %2943 = vmatpush3.bf16.msra.mxu0 %v3311_v35 }
 0xe0a   :  { %2944 = vmatprep.subr.bf16.mxu0 %v3198_v1  ;;  %2759 = vmatprep.mubr.msk.f32.mxu1 %vm3200_vm0, %v3199_v2 }
 0xe0b   :  { %2770 = vmatprep.mubr.msk.f32.mxu0 %vm3200_vm0, %v3199_v2 }
 0xe0c   :  { %2940 = vmatpush3.bf16.msra.mxu1 %v3314_v38 }
 0xe0d   :  { %2946 = vmatpush3.bf16.msra.mxu0 %v3318_v39  ;;  %2947 = vmatprep.subr.bf16.mxu1 %v3198_v1 }
 0xe0e   :  { %2953 = vmatprep.subr.bf16.mxu0 %v3198_v1 }
 0xed3   :  { %v1431_v42 = vpop.f32.mrb[14].mxu0 }
 0xed4   :  { %v2728_v43 = vpop.f32.mrb[15].mxu0 }
 0xeda   :  { %v1507_v44 = vpop.f32.mrb[14].mxu1 }
 0xedb   :  { %v1508_v45 = vadd.f32 %v1507_v44, %v1431_v42  ;;  %v1602_v46 = vpop.f32.mrb[16].mxu0  ;;  %v2739_v48 = vpop.f32.mrb[15].mxu1 }
 0xedc   :  { %v1607_v49 = vrot.slane %v1602_v46, 3  ;;  %v2750_v50 = vpop.f32.mrb[17].mxu0 }
 0xedd   :  { %v1511_v51 = vadd.f32 %v3351_v47, %v1508_v45 }
 0xede   :  { %v1609_v52 = vadd.f32 %v1607_v49, %v3301_v14 }
 0xedf   :  { %3066 = vtanh.f32 %v1511_v51  ;;  %v2431_v55 = vmul.f32 -1.442695, %v1511_v51 }
 0xee0   :  { %3068 = vtanh.f32 %v1609_v52  ;;  %v2433_v56 = vmul.f32 -1.442695, %v1609_v52 }
 0xee1   :  { %3070 = vpow2.f32 %v2431_v55 }
 0xee2   :  { %3072 = vpow2.f32 %v2433_v56 }
 0xee9   :  { %v3067_v53 = vpop.eup %3066 }
 0xeea   :  { %v3069_v54 = vpop.eup %3068  ;;  %1521 = vrot.lane.b32.xlu0 %v3067_v53, %s3201_s30 }
 0xeeb   :  { %1622 = vrot.lane.b32.xlu1 %v3069_v54, %s3201_s30  ;;  %v3071_v57 = vpop.eup %3070 }
 0xeec   :  { %v3073_v58 = vpop.eup %3072  ;;  %v1515_v59 = vadd.f32 1.0, %v3071_v57 }
 0xeed   :  { %v1613_v60 = vadd.f32 1.0, %v3073_v58 }
 0xeee   :  { %3074 = vrcp.f32 %v1515_v59 }
 0xeef   :  { %3076 = vrcp.f32 %v1613_v60 }
 0xef8   :  { %v3075_v61 = vpop.eup %3074 }
 0xef9   :  { %v3077_v63 = vpop.eup %3076  ;;  %v1519_v7 = vmul.f32 %v3075_v61, %v3476_v24 }
 0xefa   :  { %v1620_v9 = vmul.f32 %v3077_v63, %v1618_v5 }
 0xf5c   :  { %v1522_v62 = vpop.permute.xlu0 %1521 }
 0xf5d   :  { %v1524_v0 = vmul.f32 %v3075_v61, %v1522_v62  ;;  %v1623_v3 = vpop.permute.xlu1 %1622 }
 0xf5e   :  { %v1625_v4 = vmul.f32 %v3077_v63, %v1623_v3 }
 0xf5f   :  { %1526 = vrot.lane.b32.xlu0 %v1524_v0, %s3202_s8 }
 0xf60   :  { %1627 = vrot.lane.b32.xlu1 %v1625_v4, %s3202_s8 }
 0xfd1   :  { %v1527_v8 = vpop.permute.xlu0 %1526 }
 0xfd2   :  { %v3516_v11 = vadd.f32 %v1527_v8, %v1519_v7  ;;  %v1628_v12 = vpop.permute.xlu1 %1627 }
 0xfd3   :  { %v3518_v13 = vadd.f32 %v1628_v12, %v1620_v9 }
 0xfd4   :  { %3078 = vtanh.f32 %v3516_v11 }
 0xfd5   :  { %3080 = vtanh.f32 %v3518_v13  ;;  %v1895_v56 = vrot.slane %v3518_v13, 7 }
 0xfde   :  { %v3079_v15 = vpop.eup %3078 }
 0xfdf   :  { %v3081_v16 = vpop.eup %3080  ;;  %1532 = vrot.lane.b32.xlu0 %v3079_v15, %s3201_s30 }
 0xfe0   :  { %1633 = vrot.lane.b32.xlu1 %v3081_v16, %s3201_s30 }
0x1051   :  { %v1533_v17 = vpop.permute.xlu0 %1532 }
0x1052   :  { %v1535_v18 = vmul.f32 %v3075_v61, %v1533_v17  ;;  %v1634_v19 = vpop.permute.xlu1 %1633 }
0x1053   :  { %v1636_v20 = vmul.f32 %v3077_v63, %v1634_v19 }
0x1054   :  { %1638 = vrot.lane.b32.xlu0 %v1535_v18, %s3202_s8 }
0x1055   :  { %v1713_v21 = vrot.slane %v1636_v20, 5 }
0x1057   :  { %1714 = vrot.lane.b32.xlu1 %v1713_v21, %s3202_s8 }
0x10c6   :  { %v1639_v22 = vpop.permute.xlu0 %1638 }
0x10c7   :  { %2760 = vmatmul.mubr.msk.f32.vlgmr.msra.gmra.mrb[16].mxu1 %vm148_vm3, %v1639_v22 }
0x10c8   :  { %2949 = vmatpush3.bf16.msra.mxu1 %v3281_v6  ;;  %2781 = vmatprep.mubr.msk.f32.mxu1 %vm3200_vm0, %v3199_v2 }
0x10c9   :  { %v1715_v23 = vpop.permute.xlu1 %1714  ;;  %2950 = vmatprep.subr.bf16.mxu1 %v3198_v1 }
0x10ca   :  { %2771 = vmatmul.mubr.msk.f32.vlgmr.msra.gmra.mrb[18].mxu0 %vm148_vm3, %v1715_v23 }
0x10cb   :  { %2955 = vmatpush3.bf16.msra.mxu0 %v3309_v31  ;;  %2792 = vmatprep.mubr.msk.f32.mxu0 %vm3200_vm0, %v3199_v2 }
0x10cc   :  { %2952 = vmatpush3.bf16.msra.mxu1 %v3288_v10  ;;  %2956 = vmatprep.subr.bf16.mxu0 %v3198_v1 }
0x10cd   :  { %2959 = vmatprep.subr.bf16.mxu1 %v3198_v1 }
0x10cf   :  { %2782 = vmatmul.mubr.msk.f32.vlgmr.msra.gmra.mrb[18].mxu1 %vm148_vm3, %v1715_v23  ;;  %2958 = vmatpush3.bf16.msra.mxu0 %v3314_v38 }
0x10d0   :  { %2965 = vmatprep.subr.bf16.mxu0 %v3198_v1  ;;  %2961 = vmatpush3.bf16.msra.mxu1 %v3311_v35 }
0x10d1   :  { %2962 = vmatprep.subr.bf16.mxu1 %v3198_v1  ;;  %2803 = vmatprep.mubr.msk.f32.mxu1 %vm3200_vm0, %v3199_v2 }
0x10d4   :  { %2964 = vmatpush3.bf16.msra.mxu1 %v3318_v39 }
0x10d5   :  { %2971 = vmatprep.subr.bf16.mxu1 %v3198_v1 }
0x119a   :  { %v1708_v24 = vpop.f32.mrb[16].mxu1 }
0x119b   :  { %v2761_v25 = vpop.f32.mrb[17].mxu1 }
0x119d   :  { %v1784_v26 = vpop.f32.mrb[18].mxu0 }
0x119e   :  { %v1785_v27 = vadd.f32 %v1784_v26, %v1708_v24  ;;  %v2772_v28 = vpop.f32.mrb[19].mxu0 }
0x11a0   :  { %v1788_v29 = vadd.f32 %v3351_v47, %v1785_v27 }
0x11a2   :  { %3082 = vtanh.f32 %v1788_v29  ;;  %v1879_v30 = vpop.f32.mrb[18].mxu1  ;;  %v2436_v40 = vmul.f32 -1.442695, %v1788_v29 }
0x11a3   :  { %v1884_v32 = vrot.slane %v1879_v30, 2  ;;  %v2783_v33 = vpop.f32.mrb[19].mxu1 }
0x11a5   :  { %v1886_v34 = vadd.f32 %v1884_v32, %v3301_v14 }
0x11a7   :  { %3084 = vtanh.f32 %v1886_v34  ;;  %v2438_v41 = vmul.f32 -1.442695, %v1886_v34 }
0x11a8   :  { %3086 = vpow2.f32 %v2436_v40 }
0x11a9   :  { %3088 = vpow2.f32 %v2438_v41 }
0x11ac   :  { %v3083_v36 = vpop.eup %3082 }
0x11ad   :  { %1798 = vrot.lane.b32.xlu0 %v3083_v36, %s3201_s30 }
0x11b1   :  { %v3085_v37 = vpop.eup %3084 }
0x11b2   :  { %1899 = vrot.lane.b32.xlu1 %v3085_v37, %s3201_s30  ;;  %v3087_v42 = vpop.eup %3086 }
0x11b3   :  { %v1792_v43 = vadd.f32 1.0, %v3087_v42  ;;  %v3089_v44 = vpop.eup %3088 }
0x11b4   :  { %v1890_v45 = vadd.f32 1.0, %v3089_v44 }
0x11b5   :  { %3090 = vrcp.f32 %v1792_v43 }
0x11b6   :  { %3092 = vrcp.f32 %v1890_v45 }
0x11bf   :  { %v3091_v46 = vpop.eup %3090 }
0x11c0   :  { %v3093_v50 = vpop.eup %3092  ;;  %v1796_v53 = vmul.f32 %v3091_v46, %v3516_v11 }
0x11c1   :  { %v1897_v57 = vmul.f32 %v3093_v50, %v1895_v56 }
0x121f   :  { %v1799_v48 = vpop.permute.xlu0 %1798 }
0x1220   :  { %v1801_v49 = vmul.f32 %v3091_v46, %v1799_v48 }
0x1222   :  { %1803 = vrot.lane.b32.xlu0 %v1801_v49, %s3202_s8 }
0x1224   :  { %v1900_v51 = vpop.permute.xlu1 %1899 }
0x1225   :  { %v1902_v52 = vmul.f32 %v3093_v50, %v1900_v51 }
0x1227   :  { %1904 = vrot.lane.b32.xlu1 %v1902_v52, %s3202_s8 }
0x1294   :  { %v1804_v54 = vpop.permute.xlu0 %1803 }
0x1295   :  { %v3554_v55 = vadd.f32 %v1804_v54, %v1796_v53 }
0x1297   :  { %3094 = vtanh.f32 %v3554_v55 }
0x1299   :  { %v1905_v58 = vpop.permute.xlu1 %1904 }
0x129a   :  { %v3558_v59 = vadd.f32 %v1905_v58, %v1897_v57 }
0x129c   :  { %3096 = vtanh.f32 %v3558_v59  ;;  %v2172_v25 = vrot.slane %v3558_v59, 7  ;;  %v2447_v59 = vld [vmem:[%s3623_s5] ss:$0 sm:$0xff]  ;;  %s3204_s5 = smov [#allocation8]  }
0x129d   :  { %s2395_s12 = sshll.u32 %s3204_s5, 4  ;;  %s2396_s12 = int_to_ptr.vmem [resolvable:$true] %s2395_s12 }
0x129e   :  { %s3166_s13 = scalar_lea.vmem %s2396_s12, 16  ;;  %s3170_s14 = scalar_lea.vmem %s2396_s12, 32 }
0x129f   :  { %p3167_p2 = scmp.ne.s32.totalorder %s2396_s12, %s3166_s13  ;;  %p3171_p3 = scmp.lt.s32.totalorder %s2396_s12, %s2396_s12 }
0x12a0   :  { %p3172_p4 = scmp.lt.s32.totalorder %s3170_s14, %s3166_s13 }
0x12a1   :  { %v3095_v60 = vpop.eup %3094 }
0x12a2   :  { %1809 = vrot.lane.b32.xlu0 %v3095_v60, %s3201_s30  ;;  %p3173_p5 = por %p3172_p4, %p3171_p3 }
0x12a4   :  { %p3174_p6 = pnand %p3173_p5, %p3167_p2 }
0x12a6   :  { %v3097_v61 = vpop.eup %3096 }
0x12a7   :  { %1910 = vrot.lane.b32.xlu1 %v3097_v61, %s3201_s30 }
0x1314   :  { %v1810_v62 = vpop.permute.xlu0 %1809 }
0x1315   :  { %v1812_v63 = vmul.f32 %v3091_v46, %v1810_v62 }
0x1317   :  { %1915 = vrot.lane.b32.xlu0 %v1812_v63, %s3202_s8 }
0x1319   :  { %v1911_v0 = vpop.permute.xlu1 %1910 }
0x131a   :  { %v1913_v3 = vmul.f32 %v3093_v50, %v1911_v0 }
0x131c   :  { %v1990_v4 = vrot.slane %v1913_v3, 6 }
0x131e   :  { %1991 = vrot.lane.b32.xlu1 %v1990_v4, %s3202_s8 }
0x1389   :  { %v1916_v5 = vpop.permute.xlu0 %1915 }
0x138a   :  { %2793 = vmatmul.mubr.msk.f32.vlgmr.msra.gmra.mrb[20].mxu0 %vm148_vm3, %v1916_v5 }
0x138b   :  { %2967 = vmatpush3.bf16.msra.mxu0 %v3281_v6  ;;  %2814 = vmatprep.mubr.msk.f32.mxu0 %vm3200_vm0, %v3199_v2 }
0x138c   :  { %2968 = vmatprep.subr.bf16.mxu0 %v3198_v1 }
0x138f   :  { %2970 = vmatpush3.bf16.msra.mxu0 %v3288_v10 }
0x1390   :  { %v1992_v7 = vpop.permute.xlu1 %1991  ;;  %2977 = vmatprep.subr.bf16.mxu0 %v3198_v1 }
0x1391   :  { %2804 = vmatmul.mubr.msk.f32.vlgmr.msra.gmra.mrb[20].mxu1 %vm148_vm3, %v1992_v7 }
0x1392   :  { %2815 = vmatmul.mubr.msk.f32.vlgmr.msra.gmra.mrb[22].mxu0 %vm148_vm3, %v1992_v7  ;;  %2973 = vmatpush3.bf16.msra.mxu1 %v3309_v31 }
0x1393   :  { %2979 = vmatpush3.bf16.msra.mxu0 %v3311_v35  ;;  %2974 = vmatprep.subr.bf16.mxu1 %v3198_v1 }
0x1394   :  { %2980 = vmatprep.subr.bf16.mxu0 %v3198_v1  ;;  %2825 = vmatprep.mubr.msk.f32.mxu1 %vm3200_vm0, %v3199_v2 }
0x1395   :  { %2836 = vmatprep.mubr.msk.f32.mxu0 %vm3200_vm0, %v3199_v2 }
0x1396   :  { %2976 = vmatpush3.bf16.msra.mxu1 %v3314_v38 }
0x1397   :  { %2982 = vmatpush3.bf16.msra.mxu0 %v3318_v39 }
0x145d   :  { %v1985_v6 = vpop.f32.mrb[20].mxu0 }
0x145e   :  { %v2794_v10 = vpop.f32.mrb[21].mxu0 }
0x1464   :  { %v2061_v8 = vpop.f32.mrb[20].mxu1 }
0x1465   :  { %v2062_v31 = vadd.f32 %v2061_v8, %v1985_v6  ;;  %v2156_v9 = vpop.f32.mrb[22].mxu0  ;;  %v2805_v35 = vpop.f32.mrb[21].mxu1  ;;  %v2385_v6 = vld [vmem:[#allocation2] sm:$0x1] }
0x1466   :  { %v2161_v11 = vrot.slane %v2156_v9, 1  ;;  %v2816_v12 = vpop.f32.mrb[23].mxu0 }
0x1467   :  { %v2065_v1 = vadd.f32 %v3351_v47, %v2062_v31 }
0x1468   :  { %v2163_v13 = vadd.f32 %v2161_v11, %v3301_v14 }
0x1469   :  { %3098 = vtanh.f32 %v2065_v1  ;;  %v2441_v38 = vmul.f32 -1.442695, %v2065_v1 }
0x146a   :  { %3100 = vtanh.f32 %v2163_v13  ;;  %v2443_v39 = vmul.f32 -1.442695, %v2163_v13 }
0x146b   :  { %3102 = vpow2.f32 %v2441_v38 }
0x146c   :  { %3104 = vpow2.f32 %v2443_v39 }
0x1473   :  { %v3099_v15 = vpop.eup %3098 }
0x1474   :  { %v3101_v2 = vpop.eup %3100  ;;  %2075 = vrot.lane.b32.xlu1 %v3099_v15, %s3201_s30 }
0x1475   :  { %2176 = vrot.lane.b32.xlu0 %v3101_v2, %s3201_s30  ;;  %v3103_v16 = vpop.eup %3102 }
0x1476   :  { %v3105_v17 = vpop.eup %3104  ;;  %v2069_v18 = vadd.f32 1.0, %v3103_v16 }
0x1477   :  { %v2167_v19 = vadd.f32 1.0, %v3105_v17 }
0x1478   :  { %3106 = vrcp.f32 %v2069_v18 }
0x1479   :  { %3108 = vrcp.f32 %v2167_v19 }
0x1482   :  { %v3107_v20 = vpop.eup %3106 }
0x1483   :  { %v3109_v21 = vpop.eup %3108  ;;  %v2073_v26 = vmul.f32 %v3107_v20, %v3554_v55 }
0x1484   :  { %v2174_v28 = vmul.f32 %v3109_v21, %v2172_v25 }
0x14e6   :  { %v2076_v14 = vpop.permute.xlu1 %2075 }
0x14e7   :  { %v2078_v22 = vmul.f32 %v3107_v20, %v2076_v14  ;;  %v2177_v23 = vpop.permute.xlu0 %2176 }
0x14e8   :  { %v2179_v24 = vmul.f32 %v3109_v21, %v2177_v23 }
0x14e9   :  { %2080 = vrot.lane.b32.xlu1 %v2078_v22, %s3202_s8 }
0x14ea   :  { %2181 = vrot.lane.b32.xlu0 %v2179_v24, %s3202_s8 }
0x155b   :  { %v2081_v27 = vpop.permute.xlu1 %2080 }
0x155c   :  { %v2083_v29 = vadd.f32 %v2081_v27, %v2073_v26  ;;  %v2182_v30 = vpop.permute.xlu0 %2181 }
0x155d   :  { %v2184_v32 = vadd.f32 %v2182_v30, %v2174_v28 }
0x155e   :  { %3110 = vtanh.f32 %v2083_v29 }
0x155f   :  { %3112 = vtanh.f32 %v2184_v32 }
0x1568   :  { %v3111_v33 = vpop.eup %3110 }
0x1569   :  { %v3113_v34 = vpop.eup %3112  ;;  %2086 = vrot.lane.b32.xlu1 %v3111_v33, %s3201_s30 }
0x156a   :  { %2187 = vrot.lane.b32.xlu0 %v3113_v34, %s3201_s30 }
0x15db   :  { %v2087_v36 = vpop.permute.xlu1 %2086 }
0x15dc   :  { %v2089_v37 = vmul.f32 %v3107_v20, %v2087_v36  ;;  %v2188_v40 = vpop.permute.xlu0 %2187 }
0x15dd   :  { %v2190_v41 = vmul.f32 %v3109_v21, %v2188_v40 }
0x15de   :  { %2192 = vrot.lane.b32.xlu0 %v2089_v37, %s3202_s8 }
0x15df   :  { %v2267_v42 = vrot.slane %v2190_v41, 7 }
0x15e1   :  { %2268 = vrot.lane.b32.xlu1 %v2267_v42, %s3202_s8 }
0x1650   :  { %v2193_v43 = vpop.permute.xlu0 %2192 }
0x1651   :  { %2826 = vmatmul.mubr.msk.f32.vlgmr.msra.gmra.mrb[22].mxu1 %vm148_vm3, %v2193_v43 }
0x1653   :  { %v2269_v44 = vpop.permute.xlu1 %2268 }
0x1654   :  { %2837 = vmatmul.mubr.msk.f32.vlgmr.msra.gmra.mrb[24].mxu0 %vm148_vm3, %v2269_v44 }
0x1724   :  { %v2262_v45 = vpop.f32.mrb[22].mxu1 }
0x1725   :  { %v2827_v46 = vpop.f32.mrb[23].mxu1 }
0x1727   :  { %v2338_v48 = vpop.f32.mrb[24].mxu0 }
0x1728   :  { %v2339_v49 = vadd.f32 %v2338_v48, %v2262_v45  ;;  %v2838_v50 = vpop.f32.mrb[25].mxu0 }
0x172a   :  { %v2342_v51 = vadd.f32 %v3351_v47, %v2339_v49 }
0x172c   :  { %3114 = vtanh.f32 %v2342_v51  ;;  %v2446_v53 = vmul.f32 -1.442695, %v2342_v51 }
0x172e   :  { %3116 = vpow2.f32 %v2446_v53 }
0x1736   :  { %v3115_v52 = vpop.eup %3114 }
0x1737   :  { %2352 = vrot.lane.b32.xlu0 %v3115_v52, %s3201_s30 }
0x1738   :  { %v3117_v54 = vpop.eup %3116 }
0x1739   :  { %v2346_v55 = vadd.f32 1.0, %v3117_v54 }
0x173b   :  { %3118 = vrcp.f32 %v2346_v55 }
0x1745   :  { %v3119_v56 = vpop.eup %3118 }
0x1746   :  { %v2350_v47 = vmul.f32 %v3119_v56, %v2083_v29 }
0x17a9   :  { %v2353_v57 = vpop.permute.xlu0 %2352 }
0x17aa   :  { %v2355_v58 = vmul.f32 %v3119_v56, %v2353_v57 }
0x17ac   :  { %2357 = vrot.lane.b32.xlu1 %v2355_v58, %s3202_s8 }
0x17b0   :  { %2373 = vrot.lane.b32.xlu1 %v2447_v59, %s3203_s6 }
0x181e   :  { %v2358_v60 = vpop.permute.xlu1 %2357 }
0x181f   :  { %v2360_v61 = vadd.f32 %v2358_v60, %v2350_v47 }
0x1821   :  { %3120 = vtanh.f32 %v2360_v61 }
0x1822   :  { %v2374_v0 = vpop.permute.xlu1 %2373 }
0x182b   :  { %v3121_v62 = vpop.eup %3120 }
0x182c   :  { %2363 = vrot.lane.b32.xlu0 %v3121_v62, %s3201_s30 }
0x189e   :  { %v2364_v63 = vpop.permute.xlu0 %2363 }
0x189f   :  { %v2366_v3 = vmul.f32 %v3119_v56, %v2364_v63 }
0x18a1   :  { %v2376_v4 = vmul.f32 %v2374_v0, %v2366_v3 }
0x18a3   :  { %2378 = vrot.lane.b32.xlu0 %v2376_v4, %s3202_s8 }
0x1915   :  { %v2379_v5 = vpop.permute.xlu0 %2378 }
0x1916   :  { %v2382_v7 = vsel %vm2381_vm4, %v2379_v5, 0.0 }
0x1917   :  { %2383 = vadd.xlane.f32.xlu1 %v2382_v7 }
0x19a4   :  { %v2384_v10 = vpop.xlane.xlu1 %2383 }
0x19a5   :  { %v2386_v8 = vadd.f32 %v2385_v6, %v2384_v10 }
0x19a7   :  { %2388 = vst.msk [vmem:[#allocation8] sm:$0x1] %vm2387_vm5, %v2386_v8 }
0x19a8   :  { %3177 = shalt.err (!%p3174_p6)
}
0x19a9   :  { %s3178_s17 = scalar_lea.hbm %s3625_s7, 16 }
0x19aa   :  { %p3179_p7 = scmp.ne.s32.totalorder %s3625_s7, %s3178_s17  ;;  %p3182_p8 = scmp.lt.u32.totalorder %s3178_s17, %s3625_s7 }
0x19ac   :  { %p3184_p9 = pnand %p3182_p8, %p3179_p7 }
0x19ae   :  { %3187 = shalt.err (!%p3184_p9)
}
0x19af   :  { %2398 = dma.vmem_to_hbm [thread:$0]  %s2396_s12, 16, %s3625_s7, [#allocation5]  }
0x19b0   :  { %3192 = dma.done.wait [#allocation5], 16  }
0x19b1   :  { %3193 = vsyncadd [#allocation5], 4294967280 }
0x19b2   :  { %2402 = vsyncpa [#allocation4], 1 }
0x19b3   :  { %2403 = vsyncpa [#allocation7], 1 }
0x19b4   :  { %2404 = vsyncpa [#allocation5], 1 }

</bundles_post_ra>
